<compile_context>
chip_gen: v5e
topology: v5e:2x2
jax: 0.10.0
libtpu: 0.0.40
codegen_flags: <defaults>
</compile_context>

<pallas_src>
import math

import jax
import jax.numpy as jnp
from jax import lax
from jax.experimental import pallas as pl
from jax.experimental.pallas import tpu as pltpu


# --------------------------------------------------------------------------- #
# Hardware-dependent defaults (review: 256 tiles on v6e/v7x, cap VMEM on v7x). #
# --------------------------------------------------------------------------- #
def _pick_config(T):
    block, vmem_limit = 128, 32 * 1024 * 1024            # v5e / unknown default
    try:
        kind = jax.devices()[0].device_kind.lower()
    except Exception:                                     # pragma: no cover
        kind = ""
    if "v7" in kind:
        block, vmem_limit = 256, 48 * 1024 * 1024         # 64 MiB physical / TC
    elif "v6" in kind:
        block, vmem_limit = 256, 64 * 1024 * 1024         # 128 MiB physical
    block = min(block, T)
    while block > 8 and T % block != 0:
        block //= 2
    return block, vmem_limit


# --------------------------------------------------------------------------- #
# Pass A: fused QKV projection -> Q, K, V in (B, H, T, D), bf16.               #
# --------------------------------------------------------------------------- #
def _make_qkv_kernel(n_head, head_dim, n_embd):
    def kernel(x_ref, w_ref, b_ref, q_ref, k_ref, v_ref):
        x = x_ref[0]                                              # (bt, C) bf16
        qkv = jnp.dot(x, w_ref[...], preferred_element_type=jnp.float32)
        qkv = (qkv + b_ref[...]).astype(jnp.bfloat16)             # (bt, 3C)
        # Per-head split (static lane slices); happens once per element, outside
        # any attention loop.  q columns are already pre-scaled by 1/sqrt(D).
        for h in range(n_head):
            o = h * head_dim
            q_ref[0, h] = qkv[:, o:o + head_dim]
            k_ref[0, h] = qkv[:, n_embd + o:n_embd + o + head_dim]
            v_ref[0, h] = qkv[:, 2 * n_embd + o:2 * n_embd + o + head_dim]
    return kernel


# --------------------------------------------------------------------------- #
# Pass B: flash attention over packed head groups, causal pair-packed grid.    #
# --------------------------------------------------------------------------- #
def _make_flash_kernel(hp, block, head_dim):
    def kernel(qi_ref, ki_ref, q_ref, k_ref, v_ref, o_ref, m_scr, l_scr, acc_scr):
        p = pl.program_id(2)
        qi = qi_ref[p]
        ki = ki_ref[p]

        # First kv tile of this q tile: reset the online-softmax state.
        @pl.when(ki == 0)
        def _():
            m_scr[...] = jnp.full(m_scr.shape, float("-inf"), m_scr.dtype)
            l_scr[...] = jnp.zeros(l_scr.shape, l_scr.dtype)
            acc_scr[...] = jnp.zeros(acc_scr.shape, acc_scr.dtype)

        q = q_ref[0]                                              # (hp, bq, D) bf16
        k = k_ref[0]                                              # (hp, bk, D) bf16
        v = v_ref[0]                                              # (hp, bk, D) bf16

        def attend(masked):
            # QK^T: batched over the packed heads, contracting D (no transpose).
            s = lax.dot_general(
                q, k, dimension_numbers=(((2,), (2,)), ((0,), (0,))),
                preferred_element_type=jnp.float32)               # (hp, bq, bk)
            if masked:
                # Diagonal tile only (block_q == block_kv, same tile index).
                r = lax.broadcasted_iota(jnp.int32, (block, block), 0)
                c = lax.broadcasted_iota(jnp.int32, (block, block), 1)
                s = jnp.where((r >= c)[None, :, :], s, -1e30)
            m_prev = m_scr[...]
            m_new = jnp.maximum(m_prev, jnp.max(s, axis=-1, keepdims=True))
            alpha = jnp.exp(m_prev - m_new)
            p_ = jnp.exp(s - m_new)
            l_scr[...] = alpha * l_scr[...] + jnp.sum(p_, axis=-1, keepdims=True)
            pv = lax.dot_general(
                p_.astype(jnp.bfloat16), v,
                dimension_numbers=(((2,), (1,)), ((0,), (0,))),
                preferred_element_type=jnp.float32)               # (hp, bq, D)
            acc_scr[...] = alpha * acc_scr[...] + pv
            m_scr[...] = m_new

        # Strictly-below-diagonal tile: no mask ops at all.
        @pl.when(ki < qi)
        def _():
            attend(masked=False)

        # Diagonal tile: masked update, then finalize this q tile / head group.
        @pl.when(ki == qi)
        def _():
            attend(masked=True)
            inv_l = pl.reciprocal(l_scr[...], approx=True)
            o_ref[0] = (acc_scr[...] * inv_l).astype(o_ref.dtype)
    return kernel


# --------------------------------------------------------------------------- #
# Pass C: output projection  out = sum_h Y[:, h] @ Wp[h] + b.                  #
# --------------------------------------------------------------------------- #
def _make_proj_kernel(n_head, block, n_embd):
    def kernel(y_ref, w_ref, b_ref, o_ref):
        acc = jnp.zeros((block, n_embd), jnp.float32)
        for h in range(n_head):                                   # static unroll
            acc = acc + jnp.dot(y_ref[0, h], w_ref[h],
                                preferred_element_type=jnp.float32)
        o_ref[0] = (acc + b_ref[...]).astype(o_ref.dtype)         # lane-dense store
    return kernel


# --------------------------------------------------------------------------- #
# Wrapper.                                                                     #
# --------------------------------------------------------------------------- #
def causal_self_attention(x, w_qkv, b_qkv, w_proj, b_proj, *, n_head,
                          block=None, vmem_limit_bytes=None):
    """Causal self-attention: QKV projection + flash attention + output proj.

    x: (B, T, C); w_qkv: (C, 3C); b_qkv: (1, 3C); w_proj: (C, C); b_proj: (1, C).
    """
    B, T, C = x.shape
    assert C % n_head == 0, "n_embd must be divisible by n_head"
    D = C // n_head

    auto_block, auto_vmem = _pick_config(T)
    block = min(block or auto_block, T)
    vmem_limit_bytes = vmem_limit_bytes or auto_vmem
    assert T % block == 0 and block % 8 == 0, "T must tile into (8k)-sized blocks"
    n_t = T // block

    # Heads packed per attention grid step (restore density for D < 128).
    hp = 1 if D >= 128 else min(n_head, max(1, 128 // D))
    while n_head % hp:
        hp -= 1
    n_hg = n_head // hp

    # ---- rearrange params (wrapper-side plumbing, done once) ----------------
    scale = 1.0 / math.sqrt(D)
    w32 = w_qkv.astype(jnp.float32)
    b32 = b_qkv.reshape(3 * C).astype(jnp.float32)
    w_fused = jnp.concatenate(
        [w32[:, :C] * scale, w32[:, C:2 * C], w32[:, 2 * C:]], axis=1
    ).astype(jnp.bfloat16)                                        # (C, 3C)
    b_fused = jnp.concatenate(
        [b32[:C] * scale, jnp.zeros((C,), jnp.float32), b32[2 * C:]]
    ).reshape(1, 3 * C)                                           # k-bias dropped
    wp = w_proj.reshape(n_head, D, C).astype(jnp.bfloat16)        # (H, D, C)
    bp = b_proj.reshape(1, C).astype(jnp.float32)
    x_bf = x.astype(jnp.bfloat16)

    cp2 = pltpu.CompilerParams(
        dimension_semantics=("parallel", "parallel"),
        vmem_limit_bytes=vmem_limit_bytes)

    # ---- Pass A: QKV projection ---------------------------------------------
    qkv_shape = jax.ShapeDtypeStruct((B, n_head, T, D), jnp.bfloat16)
    head_out_spec = pl.BlockSpec((1, n_head, block, D), lambda b, t: (b, 0, t, 0))
    q_all, k_all, v_all = pl.pallas_call(
        _make_qkv_kernel(n_head, D, C),
        out_shape=(qkv_shape, qkv_shape, qkv_shape),
        grid_spec=pltpu.PrefetchScalarGridSpec(
            num_scalar_prefetch=0,
            grid=(B, n_t),
            in_specs=[
                pl.BlockSpec((1, block, C), lambda b, t: (b, t, 0)),   # x tile
                pl.BlockSpec((C, 3 * C), lambda b, t: (0, 0)),         # W (resident)
                pl.BlockSpec((1, 3 * C), lambda b, t: (0, 0)),         # bias
            ],
            out_specs=[head_out_spec, head_out_spec, head_out_spec],
        ),
        compiler_params=cp2,
    )(x_bf, w_fused, b_fused)

    # ---- Pass B: flash attention over (qi, ki) tile pairs (ki <= qi only) ---
    n_q = T // block
    q_idx, k_idx = [], []
    for qi in range(n_q):
        for ki in range(qi + 1):        # diagonal tile last within each qi run
            q_idx.append(qi)
            k_idx.append(ki)
    qi_map = jnp.asarray(q_idx, dtype=jnp.int32)
    ki_map = jnp.asarray(k_idx, dtype=jnp.int32)
    n_pairs = len(q_idx)

    def q_map(b, g, p, qi_r, ki_r):
        return (b, g, qi_r[p], 0)

    def kv_map(b, g, p, qi_r, ki_r):
        return (b, g, ki_r[p], 0)

    # TODO(synk): sweep pipeline_mode=pl.Buffered(3) on the K/V specs once the
    # per-step compute is tuned; left at the default depth for robustness.
    y = pl.pallas_call(
        _make_flash_kernel(hp, block, D),
        out_shape=jax.ShapeDtypeStruct((B, n_head, T, D), jnp.bfloat16),
        grid_spec=pltpu.PrefetchScalarGridSpec(
            num_scalar_prefetch=2,
            grid=(B, n_hg, n_pairs),
            in_specs=[
                pl.BlockSpec((1, hp, block, D), q_map),    # Q tile (pre-scaled)
                pl.BlockSpec((1, hp, block, D), kv_map),   # K tile
                pl.BlockSpec((1, hp, block, D), kv_map),   # V tile
            ],
            out_specs=pl.BlockSpec((1, hp, block, D), q_map),
            scratch_shapes=[
                pltpu.VMEM((hp, block, 1), jnp.float32),   # running max
                pltpu.VMEM((hp, block, 1), jnp.float32),   # running denominator
                pltpu.VMEM((hp, block, D), jnp.float32),   # attention accumulator
            ],
        ),
        compiler_params=pltpu.CompilerParams(
            dimension_semantics=("parallel", "parallel", "arbitrary"),
            vmem_limit_bytes=vmem_limit_bytes),
    )(qi_map, ki_map, q_all, k_all, v_all)

    # ---- Pass C: output projection -------------------------------------------
    out = pl.pallas_call(
        _make_proj_kernel(n_head, block, C),
        out_shape=jax.ShapeDtypeStruct((B, T, C), x.dtype),
        grid_spec=pltpu.PrefetchScalarGridSpec(
            num_scalar_prefetch=0,
            grid=(B, n_t),
            in_specs=[
                pl.BlockSpec((1, n_head, block, D), lambda b, t: (b, 0, t, 0)),
                pl.BlockSpec((n_head, D, C), lambda b, t: (0, 0, 0)),  # resident
                pl.BlockSpec((1, C), lambda b, t: (0, 0)),
            ],
            out_specs=pl.BlockSpec((1, block, C), lambda b, t: (b, t, 0)),
        ),
        compiler_params=cp2,
    )(y, wp, bp)
    return out


# --------------------------------------------------------------------------- #
# Pure-JAX f32 reference mirroring the PyTorch forward pass.                   #
# --------------------------------------------------------------------------- #
def reference_attention(x, w_qkv, b_qkv, w_proj, b_proj, *, n_head):
    B, T, C = x.shape
    D = C // n_head
    qkv = x @ w_qkv + b_qkv
    q, k, v = jnp.split(qkv, 3, axis=-1)

    def heads(a):  # (B, T, C) -> (B, H, T, D)
        return a.reshape(B, T, n_head, D).transpose(0, 2, 1, 3)

    q, k, v = heads(q), heads(k), heads(v)
    scores = (q @ k.transpose(0, 1, 3, 2)) / math.sqrt(D)
    mask = jnp.tril(jnp.ones((T, T), dtype=bool))
    scores = jnp.where(mask[None, None], scores, -jnp.inf)
    attn = jax.nn.softmax(scores, axis=-1)
    y = (attn @ v).transpose(0, 2, 1, 3).reshape(B, T, C)
    return y @ w_proj + b_proj


if __name__ == "__main__":
    # Small config that still exercises multi-tile causal pairs and head packing:
    # 4 heads of D=32 (packed 4 per step), T=512 -> >=2 q tiles at any block size.
    B, T, C, n_head = 2, 512, 128, 4

    key = jax.random.PRNGKey(0)
    kx, k1, k2, k3, k4 = jax.random.split(key, 5)

    def bf16_round(a):  # make inputs exactly bf16-representable so the kernel's
        return a.astype(jnp.bfloat16).astype(jnp.float32)  # wrapper cast is lossless

    x = bf16_round(jax.random.normal(kx, (B, T, C), dtype=jnp.float32))
    w_qkv = bf16_round(jax.random.normal(k1, (C, 3 * C), dtype=jnp.float32) / math.sqrt(C))
    b_qkv = bf16_round(jax.random.normal(k2, (1, 3 * C), dtype=jnp.float32) * 0.02)
    w_proj = bf16_round(jax.random.normal(k3, (C, C), dtype=jnp.float32) / math.sqrt(C))
    b_proj = bf16_round(jax.random.normal(k4, (1, C), dtype=jnp.float32) * 0.02)

    out = causal_self_attention(x, w_qkv, b_qkv, w_proj, b_proj, n_head=n_head)
    out = jax.block_until_ready(out)

    ref = reference_attention(x, w_qkv, b_qkv, w_proj, b_proj, n_head=n_head)
    assert out.shape == (B, T, C) and out.dtype == x.dtype

    # bf16 MXU inputs / bf16 Q,K,V,Y intermediates with f32 accumulation vs an
    # all-f32 reference: check bounded error rather than a tight f32 allclose.
    diff = (out - ref).astype(jnp.float32)
    rel_err = float(jnp.linalg.norm(diff) / jnp.linalg.norm(ref))
    max_abs = float(jnp.max(jnp.abs(diff)))
    assert rel_err < 8e-2 and max_abs < 2.5e-1, (rel_err, max_abs)

    print("KERNEL_OK")
</pallas_src>

<mosaic_0001>
module attributes {stable_mosaic.version = 11 : i64} {
  func.func @kernel(%arg0: i32, %arg1: i32, %arg2: memref<1x128x128xbf16, #tpu.memory_space<vmem>>, %arg3: memref<128x384xbf16, #tpu.memory_space<vmem>>, %arg4: memref<1x384xf32, #tpu.memory_space<vmem>>, %arg5: memref<1x4x128x32xbf16, #tpu.memory_space<vmem>>, %arg6: memref<1x4x128x32xbf16, #tpu.memory_space<vmem>>, %arg7: memref<1x4x128x32xbf16, #tpu.memory_space<vmem>>) attributes {dimension_semantics = [#tpu.dimension_semantics<parallel>, #tpu.dimension_semantics<parallel>], iteration_bounds = array<i64: 2, 4>, scalar_prefetch = 0 : i64, scratch_operands = 0 : i64, tpu.core_type = #tpu.core_type<tc>, window_params = [{transform_indices = @transform_0, window_bounds = array<i64: 1, 128, 128>}, {pipeline_mode = #tpu.pipeline_mode<synchronous>, transform_indices = @transform_1, window_bounds = array<i64: 128, 384>}, {pipeline_mode = #tpu.pipeline_mode<synchronous>, transform_indices = @transform_2, window_bounds = array<i64: 1, 384>}, {transform_indices = @transform_3, window_bounds = array<i64: 1, 4, 128, 32>}, {transform_indices = @transform_4, window_bounds = array<i64: 1, 4, 128, 32>}, {transform_indices = @transform_5, window_bounds = array<i64: 1, 4, 128, 32>}]} {
    %c0 = arith.constant 0 : index
    %c0_0 = arith.constant 0 : index
    %c0_1 = arith.constant 0 : index
    %0 = vector.load %arg2[%c0, %c0_0, %c0_1] : memref<1x128x128xbf16, #tpu.memory_space<vmem>>, vector<1x128x128xbf16>
    %1 = vector.shape_cast %0 : vector<1x128x128xbf16> to vector<128x128xbf16>
    %c0_2 = arith.constant 0 : index
    %c0_3 = arith.constant 0 : index
    %2 = vector.load %arg3[%c0_2, %c0_3] : memref<128x384xbf16, #tpu.memory_space<vmem>>, vector<128x384xbf16>
    %cst = arith.constant dense<0.000000e+00> : vector<128x384xf32>
    %3 = tpu.matmul %1, %2, %cst {dimension_numbers = #tpu.dot_dimension_numbers<[1], [0], [0], [1], [0, 0, 1, 1], [], []>} : vector<128x128xbf16>, vector<128x384xbf16>, vector<128x384xf32> -> vector<128x384xf32>
    %c0_4 = arith.constant 0 : index
    %c0_5 = arith.constant 0 : index
    %4 = vector.load %arg4[%c0_4, %c0_5] : memref<1x384xf32, #tpu.memory_space<vmem>>, vector<1x384xf32>
    %5 = vector.broadcast %4 : vector<1x384xf32> to vector<128x384xf32>
    %6 = arith.addf %3, %5 : vector<128x384xf32>
    %7 = arith.truncf %6 : vector<128x384xf32> to vector<128x384xbf16>
    %8 = vector.extract_strided_slice %7 {offsets = [0, 0], sizes = [128, 32], strides = [1, 1]} : vector<128x384xbf16> to vector<128x32xbf16>
    %c0_6 = arith.constant 0 : index
    %c0_7 = arith.constant 0 : index
    %c0_8 = arith.constant 0 : index
    %c0_9 = arith.constant 0 : index
    %9 = vector.load %arg5[%c0_6, %c0_7, %c0_8, %c0_9] : memref<1x4x128x32xbf16, #tpu.memory_space<vmem>>, vector<1x1x128x32xbf16>
    %10 = vector.shape_cast %9 : vector<1x1x128x32xbf16> to vector<128x32xbf16>
    %11 = vector.shape_cast %8 : vector<128x32xbf16> to vector<1x1x128x32xbf16>
    tpu.vector_store %arg5[%c0_6, %c0_7, %c0_8, %c0_9], %11 {strides = array<i32>} : memref<1x4x128x32xbf16, #tpu.memory_space<vmem>>, vector<1x1x128x32xbf16>,
    %12 = vector.extract_strided_slice %7 {offsets = [0, 128], sizes = [128, 32], strides = [1, 1]} : vector<128x384xbf16> to vector<128x32xbf16>
    %c0_10 = arith.constant 0 : index
    %c0_11 = arith.constant 0 : index
    %c0_12 = arith.constant 0 : index
    %c0_13 = arith.constant 0 : index
    %13 = vector.load %arg6[%c0_10, %c0_11, %c0_12, %c0_13] : memref<1x4x128x32xbf16, #tpu.memory_space<vmem>>, vector<1x1x128x32xbf16>
    %14 = vector.shape_cast %13 : vector<1x1x128x32xbf16> to vector<128x32xbf16>
    %15 = vector.shape_cast %12 : vector<128x32xbf16> to vector<1x1x128x32xbf16>
    tpu.vector_store %arg6[%c0_10, %c0_11, %c0_12, %c0_13], %15 {strides = array<i32>} : memref<1x4x128x32xbf16, #tpu.memory_space<vmem>>, vector<1x1x128x32xbf16>,
    %16 = vector.extract_strided_slice %7 {offsets = [0, 256], sizes = [128, 32], strides = [1, 1]} : vector<128x384xbf16> to vector<128x32xbf16>
    %c0_14 = arith.constant 0 : index
    %c0_15 = arith.constant 0 : index
    %c0_16 = arith.constant 0 : index
    %c0_17 = arith.constant 0 : index
    %17 = vector.load %arg7[%c0_14, %c0_15, %c0_16, %c0_17] : memref<1x4x128x32xbf16, #tpu.memory_space<vmem>>, vector<1x1x128x32xbf16>
    %18 = vector.shape_cast %17 : vector<1x1x128x32xbf16> to vector<128x32xbf16>
    %19 = vector.shape_cast %16 : vector<128x32xbf16> to vector<1x1x128x32xbf16>
    tpu.vector_store %arg7[%c0_14, %c0_15, %c0_16, %c0_17], %19 {strides = array<i32>} : memref<1x4x128x32xbf16, #tpu.memory_space<vmem>>, vector<1x1x128x32xbf16>,
    %20 = vector.extract_strided_slice %7 {offsets = [0, 32], sizes = [128, 32], strides = [1, 1]} : vector<128x384xbf16> to vector<128x32xbf16>
    %c0_18 = arith.constant 0 : index
    %c1 = arith.constant 1 : index
    %c0_19 = arith.constant 0 : index
    %c0_20 = arith.constant 0 : index
    %21 = vector.load %arg5[%c0_18, %c1, %c0_19, %c0_20] : memref<1x4x128x32xbf16, #tpu.memory_space<vmem>>, vector<1x1x128x32xbf16>
    %22 = vector.shape_cast %21 : vector<1x1x128x32xbf16> to vector<128x32xbf16>
    %23 = vector.shape_cast %20 : vector<128x32xbf16> to vector<1x1x128x32xbf16>
    tpu.vector_store %arg5[%c0_18, %c1, %c0_19, %c0_20], %23 {strides = array<i32>} : memref<1x4x128x32xbf16, #tpu.memory_space<vmem>>, vector<1x1x128x32xbf16>,
    %24 = vector.extract_strided_slice %7 {offsets = [0, 160], sizes = [128, 32], strides = [1, 1]} : vector<128x384xbf16> to vector<128x32xbf16>
    %c0_21 = arith.constant 0 : index
    %c1_22 = arith.constant 1 : index
    %c0_23 = arith.constant 0 : index
    %c0_24 = arith.constant 0 : index
    %25 = vector.load %arg6[%c0_21, %c1_22, %c0_23, %c0_24] : memref<1x4x128x32xbf16, #tpu.memory_space<vmem>>, vector<1x1x128x32xbf16>
    %26 = vector.shape_cast %25 : vector<1x1x128x32xbf16> to vector<128x32xbf16>
    %27 = vector.shape_cast %24 : vector<128x32xbf16> to vector<1x1x128x32xbf16>
    tpu.vector_store %arg6[%c0_21, %c1_22, %c0_23, %c0_24], %27 {strides = array<i32>} : memref<1x4x128x32xbf16, #tpu.memory_space<vmem>>, vector<1x1x128x32xbf16>,
    %28 = vector.extract_strided_slice %7 {offsets = [0, 288], sizes = [128, 32], strides = [1, 1]} : vector<128x384xbf16> to vector<128x32xbf16>
    %c0_25 = arith.constant 0 : index
    %c1_26 = arith.constant 1 : index
    %c0_27 = arith.constant 0 : index
    %c0_28 = arith.constant 0 : index
    %29 = vector.load %arg7[%c0_25, %c1_26, %c0_27, %c0_28] : memref<1x4x128x32xbf16, #tpu.memory_space<vmem>>, vector<1x1x128x32xbf16>
    %30 = vector.shape_cast %29 : vector<1x1x128x32xbf16> to vector<128x32xbf16>
    %31 = vector.shape_cast %28 : vector<128x32xbf16> to vector<1x1x128x32xbf16>
    tpu.vector_store %arg7[%c0_25, %c1_26, %c0_27, %c0_28], %31 {strides = array<i32>} : memref<1x4x128x32xbf16, #tpu.memory_space<vmem>>, vector<1x1x128x32xbf16>,
    %32 = vector.extract_strided_slice %7 {offsets = [0, 64], sizes = [128, 32], strides = [1, 1]} : vector<128x384xbf16> to vector<128x32xbf16>
    %c0_29 = arith.constant 0 : index
    %c2 = arith.constant 2 : index
    %c0_30 = arith.constant 0 : index
    %c0_31 = arith.constant 0 : index
    %33 = vector.load %arg5[%c0_29, %c2, %c0_30, %c0_31] : memref<1x4x128x32xbf16, #tpu.memory_space<vmem>>, vector<1x1x128x32xbf16>
    %34 = vector.shape_cast %33 : vector<1x1x128x32xbf16> to vector<128x32xbf16>
    %35 = vector.shape_cast %32 : vector<128x32xbf16> to vector<1x1x128x32xbf16>
    tpu.vector_store %arg5[%c0_29, %c2, %c0_30, %c0_31], %35 {strides = array<i32>} : memref<1x4x128x32xbf16, #tpu.memory_space<vmem>>, vector<1x1x128x32xbf16>,
    %36 = vector.extract_strided_slice %7 {offsets = [0, 192], sizes = [128, 32], strides = [1, 1]} : vector<128x384xbf16> to vector<128x32xbf16>
    %c0_32 = arith.constant 0 : index
    %c2_33 = arith.constant 2 : index
    %c0_34 = arith.constant 0 : index
    %c0_35 = arith.constant 0 : index
    %37 = vector.load %arg6[%c0_32, %c2_33, %c0_34, %c0_35] : memref<1x4x128x32xbf16, #tpu.memory_space<vmem>>, vector<1x1x128x32xbf16>
    %38 = vector.shape_cast %37 : vector<1x1x128x32xbf16> to vector<128x32xbf16>
    %39 = vector.shape_cast %36 : vector<128x32xbf16> to vector<1x1x128x32xbf16>
    tpu.vector_store %arg6[%c0_32, %c2_33, %c0_34, %c0_35], %39 {strides = array<i32>} : memref<1x4x128x32xbf16, #tpu.memory_space<vmem>>, vector<1x1x128x32xbf16>,
    %40 = vector.extract_strided_slice %7 {offsets = [0, 320], sizes = [128, 32], strides = [1, 1]} : vector<128x384xbf16> to vector<128x32xbf16>
    %c0_36 = arith.constant 0 : index
    %c2_37 = arith.constant 2 : index
    %c0_38 = arith.constant 0 : index
    %c0_39 = arith.constant 0 : index
    %41 = vector.load %arg7[%c0_36, %c2_37, %c0_38, %c0_39] : memref<1x4x128x32xbf16, #tpu.memory_space<vmem>>, vector<1x1x128x32xbf16>
    %42 = vector.shape_cast %41 : vector<1x1x128x32xbf16> to vector<128x32xbf16>
    %43 = vector.shape_cast %40 : vector<128x32xbf16> to vector<1x1x128x32xbf16>
    tpu.vector_store %arg7[%c0_36, %c2_37, %c0_38, %c0_39], %43 {strides = array<i32>} : memref<1x4x128x32xbf16, #tpu.memory_space<vmem>>, vector<1x1x128x32xbf16>,
    %44 = vector.extract_strided_slice %7 {offsets = [0, 96], sizes = [128, 32], strides = [1, 1]} : vector<128x384xbf16> to vector<128x32xbf16>
    %c0_40 = arith.constant 0 : index
    %c3 = arith.constant 3 : index
    %c0_41 = arith.constant 0 : index
    %c0_42 = arith.constant 0 : index
    %45 = vector.load %arg5[%c0_40, %c3, %c0_41, %c0_42] : memref<1x4x128x32xbf16, #tpu.memory_space<vmem>>, vector<1x1x128x32xbf16>
    %46 = vector.shape_cast %45 : vector<1x1x128x32xbf16> to vector<128x32xbf16>
    %47 = vector.shape_cast %44 : vector<128x32xbf16> to vector<1x1x128x32xbf16>
    tpu.vector_store %arg5[%c0_40, %c3, %c0_41, %c0_42], %47 {strides = array<i32>} : memref<1x4x128x32xbf16, #tpu.memory_space<vmem>>, vector<1x1x128x32xbf16>,
    %48 = vector.extract_strided_slice %7 {offsets = [0, 224], sizes = [128, 32], strides = [1, 1]} : vector<128x384xbf16> to vector<128x32xbf16>
    %c0_43 = arith.constant 0 : index
    %c3_44 = arith.constant 3 : index
    %c0_45 = arith.constant 0 : index
    %c0_46 = arith.constant 0 : index
    %49 = vector.load %arg6[%c0_43, %c3_44, %c0_45, %c0_46] : memref<1x4x128x32xbf16, #tpu.memory_space<vmem>>, vector<1x1x128x32xbf16>
    %50 = vector.shape_cast %49 : vector<1x1x128x32xbf16> to vector<128x32xbf16>
    %51 = vector.shape_cast %48 : vector<128x32xbf16> to vector<1x1x128x32xbf16>
    tpu.vector_store %arg6[%c0_43, %c3_44, %c0_45, %c0_46], %51 {strides = array<i32>} : memref<1x4x128x32xbf16, #tpu.memory_space<vmem>>, vector<1x1x128x32xbf16>,
    %52 = vector.extract_strided_slice %7 {offsets = [0, 352], sizes = [128, 32], strides = [1, 1]} : vector<128x384xbf16> to vector<128x32xbf16>
    %c0_47 = arith.constant 0 : index
    %c3_48 = arith.constant 3 : index
    %c0_49 = arith.constant 0 : index
    %c0_50 = arith.constant 0 : index
    %53 = vector.load %arg7[%c0_47, %c3_48, %c0_49, %c0_50] : memref<1x4x128x32xbf16, #tpu.memory_space<vmem>>, vector<1x1x128x32xbf16>
    %54 = vector.shape_cast %53 : vector<1x1x128x32xbf16> to vector<128x32xbf16>
    %55 = vector.shape_cast %52 : vector<128x32xbf16> to vector<1x1x128x32xbf16>
    tpu.vector_store %arg7[%c0_47, %c3_48, %c0_49, %c0_50], %55 {strides = array<i32>} : memref<1x4x128x32xbf16, #tpu.memory_space<vmem>>, vector<1x1x128x32xbf16>,
    return
  }
  func.func @transform_0(%arg0: i32, %arg1: i32) -> (i32, i32, i32) {
    %c0_i32 = arith.constant 0 : i32
    %c0_i32_0 = arith.constant 0 : i32
    return %arg0, %arg1, %c0_i32 : i32, i32, i32
  }
  func.func @transform_1(%arg0: i32, %arg1: i32) -> (i32, i32) {
    %c0_i32 = arith.constant 0 : i32
    %c0_i32_0 = arith.constant 0 : i32
    %c0_i32_1 = arith.constant 0 : i32
    return %c0_i32, %c0_i32_0 : i32, i32
  }
  func.func @transform_2(%arg0: i32, %arg1: i32) -> (i32, i32) {
    %c0_i32 = arith.constant 0 : i32
    %c0_i32_0 = arith.constant 0 : i32
    %c0_i32_1 = arith.constant 0 : i32
    return %c0_i32, %c0_i32_0 : i32, i32
  }
  func.func @transform_3(%arg0: i32, %arg1: i32) -> (i32, i32, i32, i32) {
    %c0_i32 = arith.constant 0 : i32
    %c0_i32_0 = arith.constant 0 : i32
    %c0_i32_1 = arith.constant 0 : i32
    return %arg0, %c0_i32, %arg1, %c0_i32_0 : i32, i32, i32, i32
  }
  func.func @transform_4(%arg0: i32, %arg1: i32) -> (i32, i32, i32, i32) {
    %c0_i32 = arith.constant 0 : i32
    %c0_i32_0 = arith.constant 0 : i32
    %c0_i32_1 = arith.constant 0 : i32
    return %arg0, %c0_i32, %arg1, %c0_i32_0 : i32, i32, i32, i32
  }
  func.func @transform_5(%arg0: i32, %arg1: i32) -> (i32, i32, i32, i32) {
    %c0_i32 = arith.constant 0 : i32
    %c0_i32_0 = arith.constant 0 : i32
    %c0_i32_1 = arith.constant 0 : i32
    return %arg0, %c0_i32, %arg1, %c0_i32_0 : i32, i32, i32, i32
  }
}

</mosaic_0001>

<bundles_post_ra>
// kernel: tpu_custom_call.1
= control target key start
LH: loop header
LB: loop body
LE: loop exit
PB: predicated region body
PF: predicated region fallthrough
CT: control target
= control target key end

     0   :  { %s4245_s0 = inlined_call_operand.hbm [shape: bf16[2,512,128], index: 0, kind: input, shape index: {}]   ;;  %s4246_s1 = inlined_call_operand.hbm [shape: bf16[128,384], index: 1, kind: input, shape index: {}]   ;;  %s4247_s2 = inlined_call_operand.hbm [shape: f32[1,384], index: 2, kind: input, shape index: {}]   ;;  %s4248_s3 = inlined_call_operand.vmem [shape: bf16[2,4,512,32], index: 3, kind: output, shape index: {0}]   ;;  %s4249_s4 = inlined_call_operand.vmem [shape: bf16[2,4,512,32], index: 4, kind: output, shape index: {1}]   ;;  %s4250_s5 = inlined_call_operand.vmem [shape: bf16[2,4,512,32], index: 5, kind: output, shape index: {2}]  }
   0x1   :  { %4253 = sst [smem:[#allocation14_spill]] %s4246_s1 }
   0x2   :  { %4254 = sst [smem:[#allocation15_spill]] %s4247_s2 }
   0x3   :  { %4255 = sst [smem:[#allocation16_spill]] %s4249_s4 }
   0x4   :  { %4256 = sst [smem:[#allocation17_spill]] %s4250_s5 }
   0x5   :  { %11 = vsyncpa [#allocation3], 0 }
   0x6   :  { %13 = vsyncpa [#allocation3 + $0x1], 0 }
   0x7   :  { %14 = vsyncpa [#allocation5], 0  ;;  %s3106_s18 = smov 0   ;;  %s3108_s19 = smov 0  }
   0x8   :  { %s3110_s20 = smov 0   ;;  %s3112_s21 = smov 0  }
   0x9   :  { %s3114_s22 = smov 0   ;;  %s3116_s23 = smov 0  }
   0xa   :  { %s3118_s24 = smov 0   ;;  %s3120_s25 = smov 0  }
   0xb LB: > { %4257 = sst [smem:[#allocation12_spill]] %s3057_s23  ;;  %s2447_s26 = sadd.s32 4294967295, %s3065_s25   ;;  %s3065_s25 = sphi %s3120_s25, %s20_s25   ;;  %s3061_s24 = sphi %s3118_s24, %s4275_s24   ;;  %s3057_s23 = sphi %s3116_s23, %s4270_s23   ;;  %s3053_s22 = sphi %s3114_s22, %s4274_s22   ;;  %s3049_s21 = sphi %s3112_s21, %s4269_s21   ;;  %s3045_s20 = sphi %s3110_s20, %s4273_s20   ;;  %s3041_s19 = sphi %s3108_s19, %s4272_s19   ;;  %s3037_s18 = sphi %s3106_s18, %s4271_s18  }
   0xc   : > { %p54_p0 = scmp.ne.s32.totalorder %s3041_s19, %s3037_s18  ;;  %p3146_p1 = scmp.eq.s32.totalorder %s2447_s26, 0 }
   0xd   : > { %p3150_p2 = scmp.eq.s32.totalorder %s2447_s26, 7  ;;  %p2449_p3 = scmp.ge.s32.totalorder %s3065_s25, 1 }
   0xe   : > { %p191_p4 = scmp.lt.s32.totalorder %s3065_s25, 9  ;;  %p3158_p5 = por %p3146_p1, %p54_p0 }
   0xf   : > { %s4262_s1 = sld [smem:[#allocation14_spill]]  ;;  %s3067_s9 = smov [#allocation4]  }
  0x10   : > { %p3162_p6 = pnand %p2449_p3, %p191_p4  ;;  %s204_s10 = sshll.u32 %s3067_s9, 4  ;;  %s205_s10 = int_to_ptr.vmem [resolvable:$true] %s204_s10 }
  0x11   : > { %s4263_s2 = sld [smem:[#allocation15_spill]]  ;;  %s3068_s14 = smov 192  }
  0x12   : > { %p2816_p7 = pneg %p3162_p6  ;;  %s3069_s15 = smov 12  }
  0x13   : > { %s3070_s16 = smov [#allocation6]   ;;  %s29_s18 = sadd.s32 1, %s3057_s23 }
  0x14   : > { %p2817_p8 = pnand %p2816_p7, %p3146_p1  ;;  %s219_s17 = sshll.u32 %s3070_s16, 4  ;;  %s220_s17 = int_to_ptr.vmem [resolvable:$true] %s219_s17 }
  0x15   : > { %s202_s8 = sshll.u32 %s4262_s1, 4  ;;  %p30_p9 = scmp.ge.s32.totalorder %s29_s18, 4  ;;  %s203_s8 = int_to_ptr.hbm [resolvable:$true] %s202_s8 }
  0x16   : > { %2819 = dma.hbm_to_vmem [thread:$0]  (!%p2817_p8), %s203_s8, 3072, %s205_s10, [#allocation5], %s3068_s14, %s3068_s14, %s3069_s15  }
  0x17   : > { %s217_s13 = sshll.u32 %s4263_s2, 4  ;;  %s32_s26 = sadd.s32 1, %s3061_s24  ;;  %s218_s13 = int_to_ptr.hbm [resolvable:$true] %s217_s13 }
  0x18   : > { %2822 = dma.hbm_to_vmem [thread:$0]  (!%p2817_p8), %s218_s13, 48, %s220_s17, [#allocation5]  }
  0x19   : > { %s41_s6 = sadd.s32 1, %s3045_s20  ;;  %p48_p10 = scmp.ne.s32.totalorder %s3045_s20, %s3041_s19 }
  0x1a   : > { %s4277_s18 = smov (%p30_p9, %s29_s18), 0  ;;  %s4279_s26 = smov (!%p30_p9, %s32_s26), %s3061_s24 }
  0x1b   : > { %4264 = sst [smem:[#allocation13_spill]] %s4277_s18  ;;  %s37_s7 = ssub.s32 %s3057_s23, %s4277_s18 }
  0x1c   : > { %p49_p11 = scmp.eq.s32.totalorder %s3065_s25, 0  ;;  %p34_p12 = scmp.ge.s32.totalorder %s4279_s26, 2 }
  0x1d   : > { %p3189_p13 = por %p3150_p2, %p48_p10  ;;  %p2829_p3 = scmp.lt.s32.totalorder %s3065_s25, 8 }
  0x1e   : > { %p3193_p0 = por %p49_p11, %p48_p10  ;;  %s4281_s26 = smov (%p34_p12, %s4279_s26), 0 }
  0x1f   : > { %s230_s10 = sand.u32 1, %s3045_s20   ;;  %s2454_s11 = sshll.u32 %s3057_s23, 4 }
  0x20   : > { %s36_s12 = ssub.s32 %s3061_s24, %s4281_s26  ;;  %s2453_s14 = sshll.u32 %s230_s10, 6 }
  0x21   : > { %s38_s13 = sor.u32 %s37_s7, %s36_s12  ;;  %s2455_s28 = sshll.u32 %s3061_s24, 6 }
  0x22   : > { %p39_p4 = scmp.eq.s32.totalorder %s38_s13, 0  ;;  %s234_s15 = scalar_lea.vmem [#allocation2], %s2453_s14 }
  0x23   : > { %s244_s16 = sshll.u32 %s234_s15, 4  ;;  %s239_s1 = sadd.s32 %s2455_s28, %s2454_s11  ;;  %s245_s16 = int_to_ptr.vmem [resolvable:$true] %s244_s16 }
  0x24   : > { %s3206_s17 = scalar_select %p39_p4, %s3045_s20, %s41_s6  }
  0x25   : > { %s2456_s2 = sshll.u32 %s239_s1, 2  ;;  %p2824_p2 = pnand %p2829_p3, %p3193_p0 }
  0x26   : > { %s241_s4 = scalar_lea.hbm %s4245_s0, %s2456_s2  ;;  %s231_s7 = scalar_lea.sflag [#allocation3], %s230_s10 }
  0x27   : > { %s242_s23 = sshll.u32 %s241_s4, 4  ;;  %s3071_s12 = smov 64   ;;  %s243_s23 = int_to_ptr.hbm [resolvable:$true] %s242_s23 }
  0x28   : > { %s3072_s13 = smov 4   ;;  %256 = sbr.rel (%p3162_p6) target bundleno = 658 (0x292), region = 32 }
  0x29   : > { %2826 = dma.hbm_to_vmem [thread:$0]  (!%p2824_p2), %s243_s23, 1024, %s245_s16, %s231_s7, %s3071_s12, %s3071_s12, %s3072_s13  }
  0x2a   : > { %s3218_s6 = sand.u32 (!%p3162_p6), 1, %s3041_s19  }
  0x2b   : > { %s2458_s1 = sshll.u32 (!%p3162_p6), %s3218_s6, 6  ;;  %s259_s9 = scalar_lea.sflag (!%p3162_p6), [#allocation3], %s3218_s6 }
  0x2c   : > { %s3222_s11 = scalar_lea.vmem (!%p3162_p6), [#allocation2], %s2458_s1 }
  0x2d   : > { %3028 = dma.done.wait (%p3158_p5), %s259_s9, 1024  }
  0x2e   : > { %3030 = vsyncadd (%p3158_p5), %s259_s9, 4294966272 }
  0x2f   : > { %3032 = dma.done.wait (%p3146_p1), [#allocation5], 3120  }
  0x30   : > { %3034 = vsyncadd (%p3146_p1), [#allocation5], 4294964176  ;;  %v2582_v0 = vld [vmem:[#allocation4 + $0xa8] sm:$0xf]  ;;  %v2780_v1 = vld [vmem:[#allocation4 + $0xb0] sm:$0xf0] }
  0x31   : > { %v2779_v2 = vld [vmem:[#allocation4 + $0xac] sm:$0xf]  ;;  %v2583_v3 = vor.u32 %v2780_v1, %v2582_v0  ;;  %v2584_v4 = vld [vmem:[#allocation4 + $0xb4] sm:$0xf0]  ;;  %v2590_v5 = vld [vmem:[#allocation4 + $0xb0] sm:$0xf] }
  0x32   : > { %v2781_v6 = vld [vmem:[#allocation4 + $0xb8] sm:$0xf0]  ;;  %v3232_v7 = vor.u32 %v2779_v2, %v2584_v4  ;;  %v2570_v9 = vld [vmem:[#allocation4 + $0x90] sm:$0xf]  ;;  %v2776_v11 = vld [vmem:[#allocation4 + $0x94] sm:$0xf] }
  0x33   : > { %v3234_v8 = vor.u32 %v2781_v6, %v2590_v5  ;;  %v2777_v10 = vld [vmem:[#allocation4 + $0x98] sm:$0xf0]  ;;  %543 = vmatpush.bf16.msra.mxu0 %v2583_v3  ;;  %2782 = vmatpush.bf16.msra.mxu3 %v2583_v3  ;;  %v2572_v13 = vld [vmem:[#allocation4 + $0x9c] sm:$0xf0]  ;;  %v2578_v14 = vld [vmem:[#allocation4 + $0x98] sm:$0xf] }
  0x34   : > { %v2571_v12 = vor.u32 %v2777_v10, %v2570_v9  ;;  %v2778_v15 = vld [vmem:[#allocation4 + $0xa0] sm:$0xf0]  ;;  %592 = vmatpush.bf16.msra.mxu1 %v3232_v7  ;;  %v3238_v16 = vor.u32 %v2776_v11, %v2572_v13  ;;  %v2558_v18 = vld [vmem:[#allocation4 + $0x78] sm:$0xf]  ;;  %v2773_v20 = vld [vmem:[#allocation4 + $0x7c] sm:$0xf] }
  0x35   : > { %641 = vmatpush.bf16.msra.mxu2 %v3234_v8  ;;  %v3240_v17 = vor.u32 %v2778_v15, %v2578_v14  ;;  %v2774_v19 = vld [vmem:[#allocation4 + $0x80] sm:$0xf0]  ;;  %v2560_v21 = vld [vmem:[#allocation4 + $0x84] sm:$0xf0]  ;;  %v2566_v22 = vld [vmem:[#allocation4 + $0x80] sm:$0xf] }
  0x36   : > { %v2775_v23 = vld [vmem:[#allocation4 + $0x88] sm:$0xf0]  ;;  %v2559_v24 = vor.u32 %v2774_v19, %v2558_v18  ;;  %v3244_v25 = vor.u32 %v2773_v20, %v2560_v21  ;;  %v2546_v27 = vld [vmem:[#allocation4 + $0x60] sm:$0xf]  ;;  %v2770_v29 = vld [vmem:[#allocation4 + $0x64] sm:$0xf] }
  0x37   : > { %544 = vmatpush.bf16.msra.mxu0 %v2571_v12  ;;  %2783 = vmatpush.bf16.msra.mxu3 %v2571_v12  ;;  %v3246_v26 = vor.u32 %v2775_v23, %v2566_v22  ;;  %v2771_v28 = vld [vmem:[#allocation4 + $0x68] sm:$0xf0]  ;;  %v2548_v30 = vld [vmem:[#allocation4 + $0x6c] sm:$0xf0]  ;;  %v2554_v31 = vld [vmem:[#allocation4 + $0x68] sm:$0xf] }
  0x38   : > { %593 = vmatpush.bf16.msra.mxu1 %v3238_v16  ;;  %v2772_v32 = vld [vmem:[#allocation4 + $0x70] sm:$0xf0]  ;;  %v2547_v33 = vor.u32 %v2771_v28, %v2546_v27  ;;  %v3250_v34 = vor.u32 %v2770_v29, %v2548_v30  ;;  %v2534_v36 = vld [vmem:[#allocation4 + $0x48] sm:$0xf]  ;;  %v2767_v38 = vld [vmem:[#allocation4 + $0x4c] sm:$0xf] }
  0x39   : > { %642 = vmatpush.bf16.msra.mxu2 %v3240_v17  ;;  %v3252_v35 = vor.u32 %v2772_v32, %v2554_v31  ;;  %v2768_v37 = vld [vmem:[#allocation4 + $0x50] sm:$0xf0]  ;;  %v2536_v39 = vld [vmem:[#allocation4 + $0x54] sm:$0xf0]  ;;  %v2542_v40 = vld [vmem:[#allocation4 + $0x50] sm:$0xf] }
  0x3a   : > { %v2769_v41 = vld [vmem:[#allocation4 + $0x58] sm:$0xf0]  ;;  %v2535_v42 = vor.u32 %v2768_v37, %v2534_v36  ;;  %v2539_v43 = vor.u32 %v2767_v38, %v2536_v39  ;;  %v2522_v45 = vld [vmem:[#allocation4 + $0x30] sm:$0xf]  ;;  %v2764_v47 = vld [vmem:[#allocation4 + $0x34] sm:$0xf] }
  0x3b   : > { %545 = vmatpush.bf16.msra.mxu0 %v2559_v24  ;;  %2784 = vmatpush.bf16.msra.mxu3 %v2559_v24  ;;  %v3256_v44 = vor.u32 %v2769_v41, %v2542_v40  ;;  %v2765_v46 = vld [vmem:[#allocation4 + $0x38] sm:$0xf0]  ;;  %v2524_v48 = vld [vmem:[#allocation4 + $0x3c] sm:$0xf0]  ;;  %v2530_v49 = vld [vmem:[#allocation4 + $0x38] sm:$0xf] }
  0x3c   : > { %594 = vmatpush.bf16.msra.mxu1 %v3244_v25  ;;  %v2766_v50 = vld [vmem:[#allocation4 + $0x40] sm:$0xf0]  ;;  %v2523_v51 = vor.u32 %v2765_v46, %v2522_v45  ;;  %v2527_v52 = vor.u32 %v2764_v47, %v2524_v48  ;;  %v2510_v54 = vld [vmem:[#allocation4 + $0x18] sm:$0xf]  ;;  %v2761_v56 = vld [vmem:[#allocation4 + $0x1c] sm:$0xf] }
  0x3d   : > { %643 = vmatpush.bf16.msra.mxu2 %v3246_v26  ;;  %v3259_v53 = vor.u32 %v2766_v50, %v2530_v49  ;;  %v2762_v55 = vld [vmem:[#allocation4 + $0x20] sm:$0xf0]  ;;  %v2512_v57 = vld [vmem:[#allocation4 + $0x24] sm:$0xf0]  ;;  %v2518_v58 = vld [vmem:[#allocation4 + $0x20] sm:$0xf] }
  0x3e   : > { %v2763_v59 = vld [vmem:[#allocation4 + $0x28] sm:$0xf0]  ;;  %v2511_v60 = vor.u32 %v2762_v55, %v2510_v54  ;;  %v2515_v61 = vor.u32 %v2761_v56, %v2512_v57  ;;  %v2498_v63 = vld [vmem:[#allocation4] sm:$0xf]  ;;  %v2758_v1 = vld [vmem:[#allocation4 + $0x4] sm:$0xf] }
  0x3f   : > { %546 = vmatpush.bf16.msra.mxu0 %v2547_v33  ;;  %2785 = vmatpush.bf16.msra.mxu3 %v2547_v33  ;;  %v2519_v62 = vor.u32 %v2763_v59, %v2518_v58  ;;  %v2759_v0 = vld [vmem:[#allocation4 + $0x8] sm:$0xf0]  ;;  %v2500_v2 = vld [vmem:[#allocation4 + $0xc] sm:$0xf0]  ;;  %v2506_v3 = vld [vmem:[#allocation4 + $0x8] sm:$0xf] }
  0x40   : > { %595 = vmatpush.bf16.msra.mxu1 %v3250_v34  ;;  %v2760_v4 = vld [vmem:[#allocation4 + $0x10] sm:$0xf0]  ;;  %v2499_v5 = vor.u32 %v2759_v0, %v2498_v63  ;;  %v2503_v6 = vor.u32 %v2758_v1, %v2500_v2  ;;  %v2750_v10 = vld [vmem:[%s3222_s11] sm:$0xff]  ;;  %v2751_v12 = vld [vmem:[%s3222_s11 + $0x8] sm:$0xff]  ;;  %s2461_s2 = sshll.u32 %s3218_s6, 8  ;;  %vm722_vm0 = vcmask 257024  }
  0x41   : > { %644 = vmatpush.bf16.msra.mxu2 %v3252_v35  ;;  %v2507_v9 = vor.u32 %v2760_v4, %v2506_v3  ;;  %v2756_v11 = vld [vmem:[%s3222_s11 + $0x30] sm:$0xff]  ;;  %v2757_v13 = vld [vmem:[%s3222_s11 + $0x38] sm:$0xff]  ;;  %v2754_v15 = vld [vmem:[%s3222_s11 + $0x20] sm:$0xff]  ;;  %s3288_s4 = scalar_lea.vmem [#allocation7], %s2461_s2  ;;  %s3073_s5 = smov 32  }
  0x42   : > { %v2753_v14 = vld [vmem:[%s3222_s11 + $0x18] sm:$0xff]  ;;  %s3074_s23 = smov 64   ;;  %s3075_s27 = smov 96   ;;  %v2755_v63 = vld [vmem:[%s3222_s11 + $0x28] sm:$0xff] }
  0x43   : > { %547 = vmatpush.bf16.msra.mxu0 %v2535_v42  ;;  %2786 = vmatpush.bf16.msra.mxu3 %v2535_v42  ;;  %s3297_s29 = scalar_lea.vmem [#allocation8], %s2461_s2  ;;  %s3304_s30 = scalar_lea.vmem [#allocation9], %s2461_s2 }
  0x44   : > { %596 = vmatpush.bf16.msra.mxu1 %v2539_v43  ;;  %s2739_s18 = sshll.u32 (%p3189_p13), %s3049_s21, 4  ;;  %s2740_s10 = sshll.u32 (%p3189_p13), %s3053_s22, 8 }
  0x45   : > { %645 = vmatpush.bf16.msra.mxu2 %v3256_v44  ;;  %s1389_s14 = sadd.s32 (%p3189_p13), %s2740_s10, %s2739_s18 }
  0x46   : > { %s2741_s28 = sshll.u32 (%p3189_p13), %s1389_s14, 2 }
  0x47   : > { %548 = vmatpush.bf16.msra.mxu0 %v2523_v51  ;;  %2787 = vmatpush.bf16.msra.mxu3 %v2523_v51  ;;  %s4011_s7 = scalar_lea.vmem (%p3189_p13), %s4248_s3, %s2741_s28 }
  0x48   : > { %597 = vmatpush.bf16.msra.mxu1 %v2527_v52 }
  0x49   : > { %646 = vmatpush.bf16.msra.mxu2 %v3259_v53 }
  0x4b   : > { %549 = vmatpush.bf16.msra.mxu0 %v2511_v60  ;;  %2788 = vmatpush.bf16.msra.mxu3 %v2511_v60 }
  0x4c   : > { %598 = vmatpush.bf16.msra.mxu1 %v2515_v61 }
  0x4d   : > { %647 = vmatpush.bf16.msra.mxu2 %v2519_v62 }
  0x4f   : > { %550 = vmatpush.bf16.msra.mxu0 %v2499_v5  ;;  %2789 = vmatpush.bf16.msra.mxu3 %v2499_v5 }
  0x50   : > { %599 = vmatpush.bf16.msra.mxu1 %v2503_v6 }
  0x51   : > { %648 = vmatpush.bf16.msra.mxu2 %v2507_v9 }
  0x52   : > { %551 = vmatmul.bf16.vlgmr.msra.gmra.mxu0 %v2750_v10  ;;  %581 = vmatmul.bf16.vlgmr.msra.gmra.mxu3 %v2756_v11 }
  0x53   : > { %2790 = vmatpush.bf16.msrb.mxu3 %v3232_v7  ;;  %600 = vmatmul.bf16.vlgmr.msra.gmra.mxu1 %v2750_v10  ;;  %v2752_v7 = vld [vmem:[%s3222_s11 + $0x10] sm:$0xff] }
  0x54   : > { %649 = vmatmul.bf16.vlgmr.msra.gmra.mxu2 %v2750_v10 }
  0x57   : > { %2791 = vmatpush.bf16.msrb.mxu3 %v3238_v16 }
  0x5b   : > { %2792 = vmatpush.bf16.msrb.mxu3 %v3244_v25 }
  0x5f   : > { %2793 = vmatpush.bf16.msrb.mxu3 %v3250_v34 }
  0x62   : > { %556 = vmatmul.bf16.gmra.mxu0 %v2751_v12  ;;  %586 = vmatmul.bf16.gmra.mxu3 %v2757_v13 }
  0x63   : > { %2794 = vmatpush.bf16.msrb.mxu3 %v2539_v43  ;;  %605 = vmatmul.bf16.gmra.mxu1 %v2751_v12 }
  0x64   : > { %654 = vmatmul.bf16.gmra.mxu2 %v2751_v12 }
  0x67   : > { %2795 = vmatpush.bf16.msrb.mxu3 %v2527_v52 }
  0x6b   : > { %2796 = vmatpush.bf16.msrb.mxu3 %v2515_v61 }
  0x6f   : > { %2797 = vmatpush.bf16.msrb.mxu3 %v2503_v6 }
  0x72   : > { %630 = vmatmul.bf16.vlgmr.msrb.gmra.mxu3 %v2756_v11  ;;  %561 = vmatmul.bf16.gmra.mxu0 %v2752_v7 }
  0x73   : > { %2798 = vmatpush.bf16.msra.mxu3 %v3234_v8  ;;  %610 = vmatmul.bf16.gmra.mxu1 %v2752_v7  ;;  %v359_v8 = vld [vmem:[#allocation6] sm:$0x7] }
  0x74   : > { %659 = vmatmul.bf16.gmra.mxu2 %v2752_v7  ;;  %v3279_v16 = vperm.slane %v359_v8, 0  ;;  %v3286_v23 = vperm.slane %v359_v8, 2 }
  0x77   : > { %2799 = vmatpush.bf16.msra.mxu3 %v3240_v17  ;;  %v3281_v17 = vperm.slane %v359_v8, 1 }
  0x7b   : > { %2800 = vmatpush.bf16.msra.mxu3 %v3246_v26 }
  0x7f   : > { %2801 = vmatpush.bf16.msra.mxu3 %v3252_v35 }
  0x82   : > { %635 = vmatmul.bf16.gmra.mxu3 %v2757_v13  ;;  %566 = vmatmul.bf16.gmra.mxu0 %v2753_v14 }
  0x83   : > { %2802 = vmatpush.bf16.msra.mxu3 %v3256_v44  ;;  %615 = vmatmul.bf16.gmra.mxu1 %v2753_v14 }
  0x84   : > { %664 = vmatmul.bf16.gmra.mxu2 %v2753_v14 }
  0x87   : > { %2803 = vmatpush.bf16.msra.mxu3 %v3259_v53 }
  0x8b   : > { %2804 = vmatpush.bf16.msra.mxu3 %v2519_v62 }
  0x8f   : > { %2805 = vmatpush.bf16.msra.mxu3 %v2507_v9 }
  0x92   : > { %679 = vmatmul.bf16.vlgmr.msra.gmra.mxu3 %v2756_v11  ;;  %571 = vmatmul.bf16.gmra.mxu0 %v2754_v15 }
  0x93   : > { %620 = vmatmul.bf16.gmra.mxu1 %v2754_v15 }
  0x94   : > { %669 = vmatmul.bf16.gmra.mxu2 %v2754_v15 }
  0xa2   : > { %684 = vmatmul.bf16.gmra.mxu3 %v2757_v13  ;;  %576 = vmatmul.bf16.gmra.mxu0 %v2755_v63 }
  0xa3   : > { %625 = vmatmul.bf16.gmra.mxu1 %v2755_v63 }
  0xa4   : > { %674 = vmatmul.bf16.gmra.mxu2 %v2755_v63 }
  0xcf   : > { %v552_v18 = vpop.f32.mrf.mxu0 }
  0xd0   : > { %v553_v19 = vadd.f32 %v552_v18, %v3279_v16  ;;  %v601_v20 = vpop.f32.mrf.mxu1 }
  0xd1   : > { %v602_v21 = vadd.f32 %v601_v20, %v3281_v17 }
  0xd3   : > { %v690_v22 = vpack.c.bf16 %v602_v21, %v553_v19 }
  0xd5   : > { %723 = vst.msk [vmem:[%s3288_s4] sm:$0xf] %vm722_vm0, %v690_v22  ;;  %v755_v24 = vrot.slane %v690_v22, 4  ;;  %1193 = vrot.lane.b32.xlu1 %v690_v22, %s3073_s5  ;;  %1014 = vrot.lane.b32.xlu2 %v690_v22, %s3074_s23  ;;  %v3294_v25 = vpop.f32.mrf.mxu3 }
  0xd6   : > { %819 = vrot.lane.b32.xlu0 %v690_v22, %s3075_s27  ;;  %v583_v1 = vadd.f32 %v3294_v25, %v3279_v16 }
  0xd7   : > { %v650_v26 = vpop.f32.mrf.mxu2  ;;  %787 = vst.msk [vmem:[%s3297_s29] sm:$0xf] %vm722_vm0, %v755_v24  ;;  %v554_v28 = vpop.f32.mrf.mxu0 }
  0xd8   : > { %v651_v27 = vadd.f32 %v650_v26, %v3286_v23  ;;  %v555_v29 = vadd.f32 %v554_v28, %v3279_v16  ;;  %v603_v30 = vpop.f32.mrf.mxu1 }
  0xd9   : > { %v604_v32 = vadd.f32 %v603_v30, %v3281_v17 }
  0xda   : > { %v691_v31 = vpack.c.bf16 %v651_v27, %v651_v27 }
  0xdb   : > { %v692_v33 = vpack.c.bf16 %v604_v32, %v555_v29 }
  0xdc   : > { %803 = vst.msk [vmem:[%s3304_s30] sm:$0xf] %vm722_vm0, %v691_v31 }
  0xdd   : > { %724 = vst.msk [vmem:[%s3288_s4 + $0x4] sm:$0xf] %vm722_vm0, %v692_v33  ;;  %v756_v34 = vrot.slane %v692_v33, 4  ;;  %949 = vrot.lane.b32.xlu1 %v691_v31, %s3075_s27  ;;  %1307 = vrot.lane.b32.xlu2 %v691_v31, %s3073_s5  ;;  %v3312_v35 = vpop.f32.mrf.mxu3 }
  0xde   : > { %1128 = vrot.lane.b32.xlu0 %v691_v31, %s3074_s23  ;;  %v585_v19 = vadd.f32 %v3312_v35, %v3279_v16 }
  0xdf   : > { %v652_v36 = vpop.f32.mrf.mxu2  ;;  %788 = vst.msk [vmem:[%s3297_s29 + $0x4] sm:$0xf] %vm722_vm0, %v756_v34  ;;  %v557_v38 = vpop.f32.mrf.mxu0 }
  0xe0   : > { %v653_v37 = vadd.f32 %v652_v36, %v3286_v23  ;;  %v558_v39 = vadd.f32 %v557_v38, %v3279_v16  ;;  %v606_v40 = vpop.f32.mrf.mxu1 }
  0xe1   : > { %v607_v42 = vadd.f32 %v606_v40, %v3281_v17 }
  0xe2   : > { %v693_v41 = vpack.c.bf16 %v653_v37, %v653_v37 }
  0xe3   : > { %v3322_v43 = vpack.c.bf16 %v607_v42, %v558_v39 }
  0xe4   : > { %804 = vst.msk [vmem:[%s3304_s30 + $0x4] sm:$0xf] %vm722_vm0, %v693_v41 }
  0xe5   : > { %725 = vst.msk [vmem:[%s3288_s4 + $0x8] sm:$0xf] %vm722_vm0, %v3322_v43  ;;  %v757_v44 = vrot.slane %v3322_v43, 4  ;;  %1130 = vrot.lane.b32.xlu1 %v693_v41, %s3074_s23  ;;  %1195 = vrot.lane.b32.xlu2 %v692_v33, %s3073_s5  ;;  %v3330_v45 = vpop.f32.mrf.mxu3 }
  0xe6   : > { %821 = vrot.lane.b32.xlu0 %v692_v33, %s3075_s27  ;;  %v588_v27 = vadd.f32 %v3330_v45, %v3279_v16 }
  0xe7   : > { %v655_v46 = vpop.f32.mrf.mxu2  ;;  %789 = vst.msk [vmem:[%s3297_s29 + $0x8] sm:$0xf] %vm722_vm0, %v757_v44  ;;  %v559_v47 = vpop.f32.mrf.mxu0 }
  0xe8   : > { %v656_v48 = vadd.f32 %v655_v46, %v3286_v23  ;;  %v560_v49 = vadd.f32 %v559_v47, %v3279_v16  ;;  %v608_v50 = vpop.f32.mrf.mxu1 }
  0xe9   : > { %v609_v51 = vadd.f32 %v608_v50, %v3281_v17 }
  0xea   : > { %v3338_v52 = vpack.c.bf16 %v656_v48, %v656_v48 }
  0xeb   : > { %v3340_v53 = vpack.c.bf16 %v609_v51, %v560_v49 }
  0xec   : > { %805 = vst.msk [vmem:[%s3304_s30 + $0x8] sm:$0xf] %vm722_vm0, %v3338_v52 }
  0xed   : > { %726 = vst.msk [vmem:[%s3288_s4 + $0xc] sm:$0xf] %vm722_vm0, %v3340_v53  ;;  %v758_v54 = vrot.slane %v3340_v53, 4  ;;  %823 = vrot.lane.b32.xlu1 %v3322_v43, %s3075_s27  ;;  %951 = vrot.lane.b32.xlu2 %v693_v41, %s3075_s27  ;;  %v3352_v55 = vpop.f32.mrf.mxu3 }
  0xee   : > { %1016 = vrot.lane.b32.xlu0 %v692_v33, %s3074_s23  ;;  %v590_v33 = vadd.f32 %v3352_v55, %v3279_v16 }
  0xef   : > { %v657_v56 = vpop.f32.mrf.mxu2  ;;  %790 = vst.msk [vmem:[%s3297_s29 + $0xc] sm:$0xf] %vm722_vm0, %v758_v54  ;;  %v562_v58 = vpop.f32.mrf.mxu0 }
  0xf0   : > { %v658_v57 = vadd.f32 %v657_v56, %v3286_v23  ;;  %v563_v59 = vadd.f32 %v562_v58, %v3279_v16  ;;  %v611_v60 = vpop.f32.mrf.mxu1 }
  0xf1   : > { %v612_v62 = vadd.f32 %v611_v60, %v3281_v17 }
  0xf2   : > { %v3359_v61 = vpack.c.bf16 %v658_v57, %v658_v57 }
  0xf3   : > { %v3366_v0 = vpack.c.bf16 %v612_v62, %v563_v59 }
  0xf4   : > { %806 = vst.msk [vmem:[%s3304_s30 + $0xc] sm:$0xf] %vm722_vm0, %v3359_v61 }
  0xf5   : > { %1018 = vrot.lane.b32.xlu1 %v3322_v43, %s3074_s23  ;;  %1132 = vrot.lane.b32.xlu2 %v3338_v52, %s3074_s23  ;;  %v631_v2 = vpop.f32.mrf.mxu3  ;;  %727 = vst.msk [vmem:[%s3288_s4 + $0x10] sm:$0xf] %vm722_vm0, %v3366_v0  ;;  %v759_v3 = vrot.slane %v3366_v0, 4 }
  0xf6   : > { %1309 = vrot.lane.b32.xlu0 %v693_v41, %s3073_s5  ;;  %v632_v4 = vadd.f32 %v631_v2, %v3281_v17 }
  0xf7   : > { %v660_v5 = vpop.f32.mrf.mxu2  ;;  %791 = vst.msk [vmem:[%s3297_s29 + $0x10] sm:$0xf] %vm722_vm0, %v759_v3  ;;  %v564_v6 = vpop.f32.mrf.mxu0 }
  0xf8   : > { %v661_v9 = vadd.f32 %v660_v5, %v3286_v23  ;;  %v3383_v10 = vpack.c.bf16 %v632_v4, %v583_v1  ;;  %v565_v11 = vadd.f32 %v564_v6, %v3279_v16  ;;  %v613_v12 = vpop.f32.mrf.mxu1 }
  0xf9   : > { %v614_v13 = vadd.f32 %v613_v12, %v3281_v17 }
  0xfa   : > { %v3387_v7 = vpack.c.bf16 %v661_v9, %v661_v9  ;;  %735 = vst.msk [vmem:[%s3288_s4 + $0x30] sm:$0xf] %vm722_vm0, %v3383_v10  ;;  %v767_v14 = vrot.slane %v3383_v10, 4 }
  0xfb   : > { %v3393_v8 = vpack.c.bf16 %v614_v13, %v565_v11 }
  0xfc   : > { %807 = vst.msk [vmem:[%s3304_s30 + $0x10] sm:$0xf] %vm722_vm0, %v3387_v7 }
  0xfd   : > { %799 = vst.msk [vmem:[%s3297_s29 + $0x30] sm:$0xf] %vm722_vm0, %v767_v14  ;;  %1311 = vrot.lane.b32.xlu1 %v3338_v52, %s3073_s5  ;;  %1020 = vrot.lane.b32.xlu2 %v3340_v53, %s3074_s23  ;;  %v633_v15 = vpop.f32.mrf.mxu3  ;;  %v760_v18 = vrot.slane %v3393_v8, 4 }
  0xfe   : > { %728 = vst.msk [vmem:[%s3288_s4 + $0x14] sm:$0xf] %vm722_vm0, %v3393_v8  ;;  %1197 = vrot.lane.b32.xlu0 %v3322_v43, %s3073_s5  ;;  %v634_v20 = vadd.f32 %v633_v15, %v3281_v17 }
  0xff   : > { %v662_v21 = vpop.f32.mrf.mxu2  ;;  %792 = vst.msk [vmem:[%s3297_s29 + $0x14] sm:$0xf] %vm722_vm0, %v760_v18  ;;  %v567_v37 = vpop.f32.mrf.mxu0 }
 0x100   : > { %v663_v22 = vadd.f32 %v662_v21, %v3286_v23  ;;  %v3416_v24 = vpack.c.bf16 %v634_v20, %v585_v19  ;;  %v616_v38 = vpop.f32.mrf.mxu1  ;;  %v568_v39 = vadd.f32 %v567_v37, %v3279_v16 }
 0x101   : > { %v617_v40 = vadd.f32 %v616_v38, %v3281_v17 }
 0x102   : > { %v3418_v25 = vpack.c.bf16 %v663_v22, %v663_v22  ;;  %736 = vst.msk [vmem:[%s3288_s4 + $0x34] sm:$0xf] %vm722_vm0, %v3416_v24  ;;  %v768_v26 = vrot.slane %v3416_v24, 4 }
 0x103   : > { %v702_v41 = vpack.c.bf16 %v617_v40, %v568_v39 }
 0x104   : > { %808 = vst.msk [vmem:[%s3304_s30 + $0x14] sm:$0xf] %vm722_vm0, %v3418_v25 }
 0x105   : > { %800 = vst.msk [vmem:[%s3297_s29 + $0x34] sm:$0xf] %vm722_vm0, %v768_v26  ;;  %825 = vrot.lane.b32.xlu1 %v3340_v53, %s3075_s27  ;;  %1313 = vrot.lane.b32.xlu2 %v3359_v61, %s3073_s5  ;;  %v636_v28 = vpop.f32.mrf.mxu3  ;;  %v761_v42 = vrot.slane %v702_v41, 4 }
 0x106   : > { %953 = vrot.lane.b32.xlu0 %v3338_v52, %s3075_s27  ;;  %v637_v29 = vadd.f32 %v636_v28, %v3281_v17  ;;  %729 = vst.msk [vmem:[%s3288_s4 + $0x18] sm:$0xf] %vm722_vm0, %v702_v41 }
 0x107   : > { %793 = vst.msk [vmem:[%s3297_s29 + $0x18] sm:$0xf] %vm722_vm0, %v761_v42  ;;  %v569_v43 = vpop.f32.mrf.mxu0  ;;  %v665_v47 = vpop.f32.mrf.mxu2 }
 0x108   : > { %v3438_v30 = vpack.c.bf16 %v637_v29, %v588_v27  ;;  %v618_v44 = vpop.f32.mrf.mxu1  ;;  %v570_v45 = vadd.f32 %v569_v43, %v3279_v16  ;;  %v666_v48 = vadd.f32 %v665_v47, %v3286_v23 }
 0x109   : > { %v619_v46 = vadd.f32 %v618_v44, %v3281_v17 }
 0x10a   : > { %737 = vst.msk [vmem:[%s3288_s4 + $0x38] sm:$0xf] %vm722_vm0, %v3438_v30  ;;  %v769_v31 = vrot.slane %v3438_v30, 4  ;;  %v703_v50 = vpack.c.bf16 %v666_v48, %v666_v48 }
 0x10b   : > { %v3484_v49 = vpack.c.bf16 %v619_v46, %v570_v45 }
 0x10c   : > { %801 = vst.msk [vmem:[%s3297_s29 + $0x38] sm:$0xf] %vm722_vm0, %v769_v31 }
 0x10d   : > { %1199 = vrot.lane.b32.xlu1 %v3340_v53, %s3073_s5  ;;  %827 = vrot.lane.b32.xlu2 %v3366_v0, %s3075_s27  ;;  %v638_v32 = vpop.f32.mrf.mxu3  ;;  %730 = vst.msk [vmem:[%s3288_s4 + $0x1c] sm:$0xf] %vm722_vm0, %v3484_v49  ;;  %v762_v51 = vrot.slane %v3484_v49, 4 }
 0x10e   : > { %1134 = vrot.lane.b32.xlu0 %v3359_v61, %s3074_s23  ;;  %v639_v34 = vadd.f32 %v638_v32, %v3281_v17  ;;  %809 = vst.msk [vmem:[%s3304_s30 + $0x18] sm:$0xf] %vm722_vm0, %v703_v50 }
 0x10f   : > { %794 = vst.msk [vmem:[%s3297_s29 + $0x1c] sm:$0xf] %vm722_vm0, %v762_v51  ;;  %v667_v52 = vpop.f32.mrf.mxu2  ;;  %v572_v1 = vpop.f32.mrf.mxu0 }
 0x110   : > { %v3455_v35 = vpack.c.bf16 %v639_v34, %v590_v33  ;;  %v668_v53 = vadd.f32 %v667_v52, %v3286_v23  ;;  %v621_v2 = vpop.f32.mrf.mxu1  ;;  %v573_v3 = vadd.f32 %v572_v1, %v3279_v16 }
 0x111   : > { %v622_v4 = vadd.f32 %v621_v2, %v3281_v17 }
 0x112   : > { %738 = vst.msk [vmem:[%s3288_s4 + $0x3c] sm:$0xf] %vm722_vm0, %v3455_v35  ;;  %v770_v36 = vrot.slane %v3455_v35, 4  ;;  %v3507_v54 = vpack.c.bf16 %v668_v53, %v668_v53 }
 0x113   : > { %v3553_v9 = vpack.c.bf16 %v622_v4, %v573_v3 }
 0x114   : > { %802 = vst.msk [vmem:[%s3297_s29 + $0x3c] sm:$0xf] %vm722_vm0, %v770_v36 }
 0x115   : > { %955 = vrot.lane.b32.xlu1 %v3359_v61, %s3075_s27  ;;  %1201 = vrot.lane.b32.xlu2 %v3366_v0, %s3073_s5  ;;  %810 = vst.msk [vmem:[%s3304_s30 + $0x1c] sm:$0xf] %vm722_vm0, %v3507_v54  ;;  %v763_v11 = vrot.slane %v3553_v9, 4  ;;  %v680_v15 = vpop.f32.mrf.mxu3 }
 0x116   : > { %1022 = vrot.lane.b32.xlu0 %v3366_v0, %s3074_s23  ;;  %731 = vst.msk [vmem:[%s3288_s4 + $0x20] sm:$0xf] %vm722_vm0, %v3553_v9  ;;  %v681_v28 = vadd.f32 %v680_v15, %v3286_v23 }
 0x117   : > { %795 = vst.msk [vmem:[%s3297_s29 + $0x20] sm:$0xf] %vm722_vm0, %v763_v11  ;;  %v574_v12 = vpop.f32.mrf.mxu0 }
 0x118   : > { %v623_v13 = vpop.f32.mrf.mxu1  ;;  %v3611_v39 = vpack.c.bf16 %v681_v28, %v681_v28 }
 0x119   : > { %v624_v14 = vadd.f32 %v623_v13, %v3281_v17 }
 0x11a   : > { %815 = vst.msk [vmem:[%s3304_s30 + $0x30] sm:$0xf] %vm722_vm0, %v3611_v39 }
 0x11d   : > { %1136 = vrot.lane.b32.xlu1 %v3387_v7, %s3074_s23  ;;  %957 = vrot.lane.b32.xlu2 %v3387_v7, %s3075_s27 }
 0x11e   : > { %843 = vrot.lane.b32.xlu0 %v3383_v10, %s3075_s27 }
 0x11f   : > { %v577_v52 = vpop.f32.mrf.mxu0 }
 0x120   : > { %v578_v53 = vadd.f32 %v577_v52, %v3279_v16 }
 0x125   : > { %1217 = vrot.lane.b32.xlu1 %v3383_v10, %s3073_s5  ;;  %1038 = vrot.lane.b32.xlu2 %v3383_v10, %s3074_s23 }
 0x126   : > { %1315 = vrot.lane.b32.xlu0 %v3387_v7, %s3073_s5  ;;  %v575_v7 = vadd.f32 %v574_v12, %v3279_v16 }
 0x128   : > { %v3574_v20 = vpack.c.bf16 %v624_v14, %v575_v7 }
 0x12a   : > { %v764_v26 = vrot.slane %v3574_v20, 4  ;;  %732 = vst.msk [vmem:[%s3288_s4 + $0x24] sm:$0xf] %vm722_vm0, %v3574_v20 }
 0x12c   : > { %796 = vst.msk [vmem:[%s3297_s29 + $0x24] sm:$0xf] %vm722_vm0, %v764_v26 }
 0x12d   : > { %1024 = vrot.lane.b32.xlu1 %v3393_v8, %s3074_s23  ;;  %829 = vrot.lane.b32.xlu2 %v3393_v8, %s3075_s27 }
 0x12e   : > { %1203 = vrot.lane.b32.xlu0 %v3393_v8, %s3073_s5  ;;  %v670_v8 = vpop.f32.mrf.mxu2 }
 0x12f   : > { %v1015_v55 = vpop.permute.xlu2 %1014  ;;  %v671_v21 = vadd.f32 %v670_v8, %v3286_v23 }
 0x130   : > { %2640 = vst.msk [vmem:[%s3288_s4 + $0x80] sm:$0xf] %vm722_vm0, %v1015_v55  ;;  %v1079_v56 = vrot.slane %v1015_v55, 4 }
 0x131   : > { %v3586_v27 = vpack.c.bf16 %v671_v21, %v671_v21 }
 0x132   : > { %2656 = vst.msk [vmem:[%s3297_s29 + $0x80] sm:$0xf] %vm722_vm0, %v1079_v56 }
 0x133   : > { %811 = vst.msk [vmem:[%s3304_s30 + $0x20] sm:$0xf] %vm722_vm0, %v3586_v27 }
 0x135   : > { %845 = vrot.lane.b32.xlu1 %v3416_v24, %s3075_s27  ;;  %1138 = vrot.lane.b32.xlu2 %v3418_v25, %s3074_s23 }
 0x136   : > { %959 = vrot.lane.b32.xlu0 %v3418_v25, %s3075_s27  ;;  %v672_v29 = vpop.f32.mrf.mxu2 }
 0x137   : > { %v1308_v57 = vpop.permute.xlu2 %1307  ;;  %v673_v31 = vadd.f32 %v672_v29, %v3286_v23 }
 0x138   : > { %2720 = vst.msk [vmem:[%s3304_s30 + $0xc0] sm:$0xf] %vm722_vm0, %v1308_v57 }
 0x139   : > { %v3615_v40 = vpack.c.bf16 %v673_v31, %v673_v31 }
 0x13b   : > { %812 = vst.msk [vmem:[%s3304_s30 + $0x24] sm:$0xf] %vm722_vm0, %v3615_v40 }
 0x13d   : > { %1317 = vrot.lane.b32.xlu1 %v3418_v25, %s3073_s5  ;;  %1219 = vrot.lane.b32.xlu2 %v3416_v24, %s3073_s5 }
 0x13e   : > { %1040 = vrot.lane.b32.xlu0 %v3416_v24, %s3074_s23  ;;  %v675_v11 = vpop.f32.mrf.mxu2 }
 0x13f   : > { %v1196_v58 = vpop.permute.xlu2 %1195  ;;  %v676_v12 = vadd.f32 %v675_v11, %v3286_v23 }
 0x140   : > { %2689 = vst.msk [vmem:[%s3288_s4 + $0xc4] sm:$0xf] %vm722_vm0, %v1196_v58  ;;  %v1259_v59 = vrot.slane %v1196_v58, 4 }
 0x141   : > { %v3732_v21 = vpack.c.bf16 %v676_v12, %v676_v12 }
 0x142   : > { %2705 = vst.msk [vmem:[%s3297_s29 + $0xc4] sm:$0xf] %vm722_vm0, %v1259_v59 }
 0x143   : > { %813 = vst.msk [vmem:[%s3304_s30 + $0x28] sm:$0xf] %vm722_vm0, %v3732_v21 }
 0x145   : > { %1205 = vrot.lane.b32.xlu1 %v702_v41, %s3073_s5  ;;  %1026 = vrot.lane.b32.xlu2 %v702_v41, %s3074_s23 }
 0x146   : > { %831 = vrot.lane.b32.xlu0 %v702_v41, %s3075_s27 }
 0x147   : > { %v1194_v60 = vpop.permute.xlu1 %1193  ;;  %v952_v61 = vpop.permute.xlu2 %951 }
 0x148   : > { %2688 = vst.msk [vmem:[%s3288_s4 + $0xc0] sm:$0xf] %vm722_vm0, %v1194_v60  ;;  %v1258_v62 = vrot.slane %v1194_v60, 4  ;;  %v820_v63 = vpop.permute.xlu0 %819 }
 0x149   : > { %2625 = vst.msk [vmem:[%s3304_s30 + $0x44] sm:$0xf] %vm722_vm0, %v952_v61  ;;  %v884_v0 = vrot.slane %v820_v63, 4  ;;  %v579_v61 = vpop.f32.mrf.mxu0 }
 0x14a   : > { %2704 = vst.msk [vmem:[%s3297_s29 + $0xc0] sm:$0xf] %vm722_vm0, %v1258_v62 }
 0x14b   : > { %2592 = vst.msk [vmem:[%s3288_s4 + $0x40] sm:$0xf] %vm722_vm0, %v820_v63  ;;  %v580_v63 = vadd.f32 %v579_v61, %v3279_v16 }
 0x14c   : > { %2608 = vst.msk [vmem:[%s3297_s29 + $0x40] sm:$0xf] %vm722_vm0, %v884_v0 }
 0x14d   : > { %961 = vrot.lane.b32.xlu1 %v703_v50, %s3075_s27  ;;  %847 = vrot.lane.b32.xlu2 %v3438_v30, %s3075_s27 }
 0x14e   : > { %1140 = vrot.lane.b32.xlu0 %v703_v50, %s3074_s23 }
 0x14f   : > { %v950_v5 = vpop.permute.xlu1 %949  ;;  %v1133_v6 = vpop.permute.xlu2 %1132 }
 0x150   : > { %2624 = vst.msk [vmem:[%s3304_s30 + $0x40] sm:$0xf] %vm722_vm0, %v950_v5  ;;  %v1129_v10 = vpop.permute.xlu0 %1128 }
 0x151   : > { %2674 = vst.msk [vmem:[%s3304_s30 + $0x88] sm:$0xf] %vm722_vm0, %v1133_v6 }
 0x152   : > { %2672 = vst.msk [vmem:[%s3304_s30 + $0x80] sm:$0xf] %vm722_vm0, %v1129_v10 }
 0x155   : > { %1042 = vrot.lane.b32.xlu1 %v3438_v30, %s3074_s23  ;;  %1319 = vrot.lane.b32.xlu2 %v703_v50, %s3073_s5 }
 0x156   : > { %1221 = vrot.lane.b32.xlu0 %v3438_v30, %s3073_s5  ;;  %v682_v30 = vpop.f32.mrf.mxu3 }
 0x157   : > { %v1131_v18 = vpop.permute.xlu1 %1130  ;;  %v1021_v19 = vpop.permute.xlu2 %1020  ;;  %v683_v34 = vadd.f32 %v682_v30, %v3286_v23 }
 0x158   : > { %2673 = vst.msk [vmem:[%s3304_s30 + $0x84] sm:$0xf] %vm722_vm0, %v1131_v18  ;;  %v1082_v22 = vrot.slane %v1021_v19, 4  ;;  %v822_v24 = vpop.permute.xlu0 %821 }
 0x159   : > { %2643 = vst.msk [vmem:[%s3288_s4 + $0x8c] sm:$0xf] %vm722_vm0, %v1021_v19  ;;  %v885_v25 = vrot.slane %v822_v24, 4  ;;  %v3619_v41 = vpack.c.bf16 %v683_v34, %v683_v34 }
 0x15a   : > { %2659 = vst.msk [vmem:[%s3297_s29 + $0x8c] sm:$0xf] %vm722_vm0, %v1082_v22 }
 0x15b   : > { %2593 = vst.msk [vmem:[%s3288_s4 + $0x44] sm:$0xf] %vm722_vm0, %v822_v24  ;;  %v677_v24 = vpop.f32.mrf.mxu2 }
 0x15c   : > { %2609 = vst.msk [vmem:[%s3297_s29 + $0x44] sm:$0xf] %vm722_vm0, %v885_v25  ;;  %v678_v25 = vadd.f32 %v677_v24, %v3286_v23 }
 0x15d   : > { %833 = vrot.lane.b32.xlu1 %v3484_v49, %s3075_s27  ;;  %1207 = vrot.lane.b32.xlu2 %v3484_v49, %s3073_s5  ;;  %816 = vst.msk [vmem:[%s3304_s30 + $0x34] sm:$0xf] %vm722_vm0, %v3619_v41 }
 0x15e   : > { %1028 = vrot.lane.b32.xlu0 %v3484_v49, %s3074_s23  ;;  %v685_v1 = vpop.f32.mrf.mxu3  ;;  %v3757_v29 = vpack.c.bf16 %v678_v25, %v678_v25 }
 0x15f   : > { %v824_v32 = vpop.permute.xlu1 %823  ;;  %v1314_v33 = vpop.permute.xlu2 %1313  ;;  %v686_v5 = vadd.f32 %v685_v1, %v3286_v23 }
 0x160   : > { %2594 = vst.msk [vmem:[%s3288_s4 + $0x48] sm:$0xf] %vm722_vm0, %v824_v32  ;;  %v886_v36 = vrot.slane %v824_v32, 4  ;;  %v1017_v37 = vpop.permute.xlu0 %1016 }
 0x161   : > { %2723 = vst.msk [vmem:[%s3304_s30 + $0xcc] sm:$0xf] %vm722_vm0, %v1314_v33  ;;  %v1080_v38 = vrot.slane %v1017_v37, 4  ;;  %v3708_v10 = vpack.c.bf16 %v686_v5, %v686_v5 }
 0x162   : > { %2610 = vst.msk [vmem:[%s3297_s29 + $0x48] sm:$0xf] %vm722_vm0, %v886_v36 }
 0x163   : > { %2641 = vst.msk [vmem:[%s3288_s4 + $0x84] sm:$0xf] %vm722_vm0, %v1017_v37 }
 0x164   : > { %2657 = vst.msk [vmem:[%s3297_s29 + $0x84] sm:$0xf] %vm722_vm0, %v1080_v38 }
 0x165   : > { %1142 = vrot.lane.b32.xlu1 %v3507_v54, %s3074_s23  ;;  %963 = vrot.lane.b32.xlu2 %v3507_v54, %s3075_s27  ;;  %817 = vst.msk [vmem:[%s3304_s30 + $0x38] sm:$0xf] %vm722_vm0, %v3708_v10 }
 0x166   : > { %849 = vrot.lane.b32.xlu0 %v3455_v35, %s3075_s27  ;;  %v687_v13 = vpop.f32.mrf.mxu3  ;;  %814 = vst.msk [vmem:[%s3304_s30 + $0x2c] sm:$0xf] %vm722_vm0, %v3757_v29 }
 0x167   : > { %v1019_v42 = vpop.permute.xlu1 %1018  ;;  %v828_v43 = vpop.permute.xlu2 %827  ;;  %v688_v7 = vadd.f32 %v687_v13, %v3286_v23 }
 0x168   : > { %2642 = vst.msk [vmem:[%s3288_s4 + $0x88] sm:$0xf] %vm722_vm0, %v1019_v42  ;;  %v1081_v44 = vrot.slane %v1019_v42, 4  ;;  %v888_v45 = vrot.slane %v828_v43, 4  ;;  %v1310_v46 = vpop.permute.xlu0 %1309 }
 0x169   : > { %2596 = vst.msk [vmem:[%s3288_s4 + $0x50] sm:$0xf] %vm722_vm0, %v828_v43  ;;  %v3736_v22 = vpack.c.bf16 %v688_v7, %v688_v7 }
 0x16a   : > { %2658 = vst.msk [vmem:[%s3297_s29 + $0x88] sm:$0xf] %vm722_vm0, %v1081_v44 }
 0x16b   : > { %2612 = vst.msk [vmem:[%s3297_s29 + $0x50] sm:$0xf] %vm722_vm0, %v888_v45 }
 0x16c   : > { %2721 = vst.msk [vmem:[%s3304_s30 + $0xc4] sm:$0xf] %vm722_vm0, %v1310_v46 }
 0x16d   : > { %1223 = vrot.lane.b32.xlu1 %v3455_v35, %s3073_s5  ;;  %1044 = vrot.lane.b32.xlu2 %v3455_v35, %s3074_s23  ;;  %v626_v35 = vpop.f32.mrf.mxu1  ;;  %818 = vst.msk [vmem:[%s3304_s30 + $0x3c] sm:$0xf] %vm722_vm0, %v3736_v22 }
 0x16e   : > { %1321 = vrot.lane.b32.xlu0 %v3507_v54, %s3073_s5  ;;  %v627_v54 = vadd.f32 %v626_v35, %v3281_v17 }
 0x16f   : > { %v1312_v47 = vpop.permute.xlu1 %1311  ;;  %v1202_v48 = vpop.permute.xlu2 %1201 }
 0x170   : > { %2722 = vst.msk [vmem:[%s3304_s30 + $0xc8] sm:$0xf] %vm722_vm0, %v1312_v47  ;;  %v1262_v49 = vrot.slane %v1202_v48, 4  ;;  %v1198_v50 = vpop.permute.xlu0 %1197  ;;  %v3672_v55 = vpack.c.bf16 %v627_v54, %v578_v53 }
 0x171   : > { %2692 = vst.msk [vmem:[%s3288_s4 + $0xd0] sm:$0xf] %vm722_vm0, %v1202_v48  ;;  %v1260_v51 = vrot.slane %v1198_v50, 4 }
 0x172   : > { %2708 = vst.msk [vmem:[%s3297_s29 + $0xd0] sm:$0xf] %vm722_vm0, %v1262_v49  ;;  %v765_v60 = vrot.slane %v3672_v55, 4 }
 0x173   : > { %2690 = vst.msk [vmem:[%s3288_s4 + $0xc8] sm:$0xf] %vm722_vm0, %v1198_v50 }
 0x174   : > { %2706 = vst.msk [vmem:[%s3297_s29 + $0xc8] sm:$0xf] %vm722_vm0, %v1260_v51 }
 0x175   : > { %1030 = vrot.lane.b32.xlu1 %v3553_v9, %s3074_s23  ;;  %835 = vrot.lane.b32.xlu2 %v3553_v9, %s3075_s27  ;;  %733 = vst.msk [vmem:[%s3288_s4 + $0x28] sm:$0xf] %vm722_vm0, %v3672_v55  ;;  %v628_v62 = vpop.f32.mrf.mxu1 }
 0x176   : > { %1209 = vrot.lane.b32.xlu0 %v3553_v9, %s3073_s5  ;;  %797 = vst.msk [vmem:[%s3297_s29 + $0x28] sm:$0xf] %vm722_vm0, %v765_v60  ;;  %v629_v0 = vadd.f32 %v628_v62, %v3281_v17 }
 0x177   : > { %v826_v56 = vpop.permute.xlu1 %825  ;;  %v958_v57 = vpop.permute.xlu2 %957 }
 0x178   : > { %2595 = vst.msk [vmem:[%s3288_s4 + $0x4c] sm:$0xf] %vm722_vm0, %v826_v56  ;;  %v887_v58 = vrot.slane %v826_v56, 4  ;;  %v954_v59 = vpop.permute.xlu0 %953  ;;  %v3696_v4 = vpack.c.bf16 %v629_v0, %v580_v63 }
 0x179   : > { %2628 = vst.msk [vmem:[%s3304_s30 + $0x50] sm:$0xf] %vm722_vm0, %v958_v57 }
 0x17a   : > { %2611 = vst.msk [vmem:[%s3297_s29 + $0x4c] sm:$0xf] %vm722_vm0, %v887_v58  ;;  %v766_v17 = vrot.slane %v3696_v4, 4 }
 0x17b   : > { %2626 = vst.msk [vmem:[%s3304_s30 + $0x48] sm:$0xf] %vm722_vm0, %v954_v59 }
 0x17c   : > { %734 = vst.msk [vmem:[%s3288_s4 + $0x2c] sm:$0xf] %vm722_vm0, %v3696_v4 }
 0x17d   : > { %973 = vrot.lane.b32.xlu1 %v3611_v39, %s3075_s27  ;;  %1144 = vrot.lane.b32.xlu2 %v3586_v27, %s3074_s23  ;;  %798 = vst.msk [vmem:[%s3297_s29 + $0x2c] sm:$0xf] %vm722_vm0, %v766_v17 }
 0x17e   : > { %965 = vrot.lane.b32.xlu0 %v3586_v27, %s3075_s27 }
 0x17f   : > { %v1200_v2 = vpop.permute.xlu1 %1199  ;;  %v1039_v3 = vpop.permute.xlu2 %1038 }
 0x180   : > { %2691 = vst.msk [vmem:[%s3288_s4 + $0xcc] sm:$0xf] %vm722_vm0, %v1200_v2  ;;  %v1261_v6 = vrot.slane %v1200_v2, 4  ;;  %v1091_v9 = vrot.slane %v1039_v3, 4  ;;  %v1135_v16 = vpop.permute.xlu0 %1134 }
 0x181   : > { %2652 = vst.msk [vmem:[%s3288_s4 + $0xb0] sm:$0xf] %vm722_vm0, %v1039_v3 }
 0x182   : > { %2707 = vst.msk [vmem:[%s3297_s29 + $0xcc] sm:$0xf] %vm722_vm0, %v1261_v6 }
 0x183   : > { %2668 = vst.msk [vmem:[%s3297_s29 + $0xb0] sm:$0xf] %vm722_vm0, %v1091_v9 }
 0x184   : > { %2675 = vst.msk [vmem:[%s3304_s30 + $0x8c] sm:$0xf] %vm722_vm0, %v1135_v16 }
 0x185   : > { %1323 = vrot.lane.b32.xlu1 %v3586_v27, %s3073_s5  ;;  %1331 = vrot.lane.b32.xlu2 %v3611_v39, %s3073_s5 }
 0x186   : > { %1152 = vrot.lane.b32.xlu0 %v3611_v39, %s3074_s23 }
 0x187   : > { %v956_v14 = vpop.permute.xlu1 %955  ;;  %v830_v8 = vpop.permute.xlu2 %829 }
 0x188   : > { %2627 = vst.msk [vmem:[%s3304_s30 + $0x4c] sm:$0xf] %vm722_vm0, %v956_v14  ;;  %v889_v15 = vrot.slane %v830_v8, 4  ;;  %v1023_v18 = vpop.permute.xlu0 %1022 }
 0x189   : > { %2597 = vst.msk [vmem:[%s3288_s4 + $0x54] sm:$0xf] %vm722_vm0, %v830_v8  ;;  %v1083_v19 = vrot.slane %v1023_v18, 4 }
 0x18a   : > { %2613 = vst.msk [vmem:[%s3297_s29 + $0x54] sm:$0xf] %vm722_vm0, %v889_v15 }
 0x18b   : > { %2644 = vst.msk [vmem:[%s3288_s4 + $0x90] sm:$0xf] %vm722_vm0, %v1023_v18 }
 0x18c   : > { %2660 = vst.msk [vmem:[%s3297_s29 + $0x90] sm:$0xf] %vm722_vm0, %v1083_v19 }
 0x18d   : > { %1211 = vrot.lane.b32.xlu1 %v3574_v20, %s3073_s5  ;;  %1032 = vrot.lane.b32.xlu2 %v3574_v20, %s3074_s23 }
 0x18e   : > { %837 = vrot.lane.b32.xlu0 %v3574_v20, %s3075_s27 }
 0x18f   : > { %v1137_v26 = vpop.permute.xlu1 %1136  ;;  %v1139_v27 = vpop.permute.xlu2 %1138 }
 0x190   : > { %2676 = vst.msk [vmem:[%s3304_s30 + $0x90] sm:$0xf] %vm722_vm0, %v1137_v26  ;;  %v844_v28 = vpop.permute.xlu0 %843 }
 0x191   : > { %2677 = vst.msk [vmem:[%s3304_s30 + $0x94] sm:$0xf] %vm722_vm0, %v1139_v27  ;;  %v896_v23 = vrot.slane %v844_v28, 4 }
 0x192   : > { %2604 = vst.msk [vmem:[%s3288_s4 + $0x70] sm:$0xf] %vm722_vm0, %v844_v28 }
 0x193   : > { %2620 = vst.msk [vmem:[%s3297_s29 + $0x70] sm:$0xf] %vm722_vm0, %v896_v23 }
 0x195   : > { %967 = vrot.lane.b32.xlu1 %v3615_v40, %s3075_s27  ;;  %975 = vrot.lane.b32.xlu2 %v3619_v41, %s3075_s27 }
 0x196   : > { %1146 = vrot.lane.b32.xlu0 %v3615_v40, %s3074_s23 }
 0x197   : > { %v1218_v20 = vpop.permute.xlu1 %1217  ;;  %v1220_v30 = vpop.permute.xlu2 %1219 }
 0x198   : > { %2700 = vst.msk [vmem:[%s3288_s4 + $0xf0] sm:$0xf] %vm722_vm0, %v1218_v20  ;;  %v1270_v31 = vrot.slane %v1218_v20, 4  ;;  %v1271_v32 = vrot.slane %v1220_v30, 4  ;;  %v1316_v33 = vpop.permute.xlu0 %1315 }
 0x199   : > { %2701 = vst.msk [vmem:[%s3288_s4 + $0xf4] sm:$0xf] %vm722_vm0, %v1220_v30 }
 0x19a   : > { %2716 = vst.msk [vmem:[%s3297_s29 + $0xf0] sm:$0xf] %vm722_vm0, %v1270_v31 }
 0x19b   : > { %2717 = vst.msk [vmem:[%s3297_s29 + $0xf4] sm:$0xf] %vm722_vm0, %v1271_v32 }
 0x19c   : > { %2724 = vst.msk [vmem:[%s3304_s30 + $0xd0] sm:$0xf] %vm722_vm0, %v1316_v33 }
 0x19d   : > { %1154 = vrot.lane.b32.xlu1 %v3619_v41, %s3074_s23  ;;  %1325 = vrot.lane.b32.xlu2 %v3615_v40, %s3073_s5 }
 0x19e   : > { %1034 = vrot.lane.b32.xlu0 %v3672_v55, %s3074_s23 }
 0x19f   : > { %v1025_v34 = vpop.permute.xlu1 %1024  ;;  %v1027_v36 = vpop.permute.xlu2 %1026 }
 0x1a0   : > { %2645 = vst.msk [vmem:[%s3288_s4 + $0x94] sm:$0xf] %vm722_vm0, %v1025_v34  ;;  %v1084_v37 = vrot.slane %v1025_v34, 4  ;;  %v1085_v38 = vrot.slane %v1027_v36, 4  ;;  %v1204_v39 = vpop.permute.xlu0 %1203 }
 0x1a1   : > { %2646 = vst.msk [vmem:[%s3288_s4 + $0x98] sm:$0xf] %vm722_vm0, %v1027_v36  ;;  %v1263_v42 = vrot.slane %v1204_v39, 4 }
 0x1a2   : > { %2661 = vst.msk [vmem:[%s3297_s29 + $0x94] sm:$0xf] %vm722_vm0, %v1084_v37 }
 0x1a3   : > { %2662 = vst.msk [vmem:[%s3297_s29 + $0x98] sm:$0xf] %vm722_vm0, %v1085_v38 }
 0x1a4   : > { %2693 = vst.msk [vmem:[%s3288_s4 + $0xd4] sm:$0xf] %vm722_vm0, %v1204_v39 }
 0x1a5   : > { %2709 = vst.msk [vmem:[%s3297_s29 + $0xd4] sm:$0xf] %vm722_vm0, %v1263_v42  ;;  %839 = vrot.lane.b32.xlu1 %v3672_v55, %s3075_s27  ;;  %1213 = vrot.lane.b32.xlu2 %v3672_v55, %s3073_s5 }
 0x1a6   : > { %977 = vrot.lane.b32.xlu0 %v3708_v10, %s3075_s27 }
 0x1a7   : > { %v846_v40 = vpop.permute.xlu1 %845  ;;  %v848_v43 = vpop.permute.xlu2 %847 }
 0x1a8   : > { %2605 = vst.msk [vmem:[%s3288_s4 + $0x74] sm:$0xf] %vm722_vm0, %v846_v40  ;;  %v897_v44 = vrot.slane %v846_v40, 4  ;;  %v898_v45 = vrot.slane %v848_v43, 4  ;;  %v960_v46 = vpop.permute.xlu0 %959 }
 0x1a9   : > { %2606 = vst.msk [vmem:[%s3288_s4 + $0x78] sm:$0xf] %vm722_vm0, %v848_v43 }
 0x1aa   : > { %2621 = vst.msk [vmem:[%s3297_s29 + $0x74] sm:$0xf] %vm722_vm0, %v897_v44 }
 0x1ab   : > { %2622 = vst.msk [vmem:[%s3297_s29 + $0x78] sm:$0xf] %vm722_vm0, %v898_v45 }
 0x1ac   : > { %2629 = vst.msk [vmem:[%s3304_s30 + $0x54] sm:$0xf] %vm722_vm0, %v960_v46 }
 0x1ad   : > { %1148 = vrot.lane.b32.xlu1 %v3732_v21, %s3074_s23  ;;  %969 = vrot.lane.b32.xlu2 %v3732_v21, %s3075_s27 }
 0x1ae   : > { %1327 = vrot.lane.b32.xlu0 %v3732_v21, %s3073_s5 }
 0x1af   : > { %v1318_v47 = vpop.permute.xlu1 %1317  ;;  %v1320_v48 = vpop.permute.xlu2 %1319 }
 0x1b0   : > { %2725 = vst.msk [vmem:[%s3304_s30 + $0xd4] sm:$0xf] %vm722_vm0, %v1318_v47  ;;  %v1041_v49 = vpop.permute.xlu0 %1040 }
 0x1b1   : > { %2726 = vst.msk [vmem:[%s3304_s30 + $0xd8] sm:$0xf] %vm722_vm0, %v1320_v48  ;;  %v1092_v50 = vrot.slane %v1041_v49, 4 }
 0x1b2   : > { %2653 = vst.msk [vmem:[%s3288_s4 + $0xb4] sm:$0xf] %vm722_vm0, %v1041_v49 }
 0x1b3   : > { %2669 = vst.msk [vmem:[%s3297_s29 + $0xb4] sm:$0xf] %vm722_vm0, %v1092_v50 }
 0x1b5   : > { %1036 = vrot.lane.b32.xlu1 %v3696_v4, %s3074_s23  ;;  %1156 = vrot.lane.b32.xlu2 %v3708_v10, %s3074_s23 }
 0x1b6   : > { %1215 = vrot.lane.b32.xlu0 %v3696_v4, %s3073_s5 }
 0x1b7   : > { %v1206_v51 = vpop.permute.xlu1 %1205  ;;  %v1208_v52 = vpop.permute.xlu2 %1207 }
 0x1b8   : > { %2694 = vst.msk [vmem:[%s3288_s4 + $0xd8] sm:$0xf] %vm722_vm0, %v1206_v51  ;;  %v1264_v35 = vrot.slane %v1206_v51, 4  ;;  %v1265_v53 = vrot.slane %v1208_v52, 4  ;;  %v832_v54 = vpop.permute.xlu0 %831 }
 0x1b9   : > { %2695 = vst.msk [vmem:[%s3288_s4 + $0xdc] sm:$0xf] %vm722_vm0, %v1208_v52  ;;  %v890_v55 = vrot.slane %v832_v54, 4 }
 0x1ba   : > { %2710 = vst.msk [vmem:[%s3297_s29 + $0xd8] sm:$0xf] %vm722_vm0, %v1264_v35 }
 0x1bb   : > { %2711 = vst.msk [vmem:[%s3297_s29 + $0xdc] sm:$0xf] %vm722_vm0, %v1265_v53 }
 0x1bc   : > { %2598 = vst.msk [vmem:[%s3288_s4 + $0x58] sm:$0xf] %vm722_vm0, %v832_v54 }
 0x1bd   : > { %2614 = vst.msk [vmem:[%s3297_s29 + $0x58] sm:$0xf] %vm722_vm0, %v890_v55  ;;  %979 = vrot.lane.b32.xlu1 %v3736_v22, %s3075_s27  ;;  %841 = vrot.lane.b32.xlu2 %v3696_v4, %s3075_s27 }
 0x1be   : > { %971 = vrot.lane.b32.xlu0 %v3757_v29, %s3075_s27 }
 0x1bf   : > { %v962_v56 = vpop.permute.xlu1 %961  ;;  %v964_v57 = vpop.permute.xlu2 %963 }
 0x1c0   : > { %2630 = vst.msk [vmem:[%s3304_s30 + $0x58] sm:$0xf] %vm722_vm0, %v962_v56  ;;  %v1141_v58 = vpop.permute.xlu0 %1140 }
 0x1c1   : > { %2631 = vst.msk [vmem:[%s3304_s30 + $0x5c] sm:$0xf] %vm722_vm0, %v964_v57 }
 0x1c2   : > { %2678 = vst.msk [vmem:[%s3304_s30 + $0x98] sm:$0xf] %vm722_vm0, %v1141_v58 }
 0x1c5   : > { %1329 = vrot.lane.b32.xlu1 %v3757_v29, %s3073_s5  ;;  %1150 = vrot.lane.b32.xlu2 %v3757_v29, %s3074_s23 }
 0x1c6   : > { %1158 = vrot.lane.b32.xlu0 %v3736_v22, %s3074_s23 }
 0x1c7   : > { %v1043_v59 = vpop.permute.xlu1 %1042  ;;  %v1045_v60 = vpop.permute.xlu2 %1044 }
 0x1c8   : > { %2654 = vst.msk [vmem:[%s3288_s4 + $0xb8] sm:$0xf] %vm722_vm0, %v1043_v59  ;;  %v1093_v61 = vrot.slane %v1043_v59, 4  ;;  %v1094_v62 = vrot.slane %v1045_v60, 4  ;;  %v1222_v63 = vpop.permute.xlu0 %1221  ;;  %v1408_v59 = vld [vmem:[%s3288_s4] sm:$0xff] (%p3189_p13)  }
 0x1c9   : > { %2655 = vst.msk [vmem:[%s3288_s4 + $0xbc] sm:$0xf] %vm722_vm0, %v1045_v60  ;;  %v1272_v0 = vrot.slane %v1222_v63, 4  ;;  %v1412_v60 = vld [vmem:[%s3288_s4 + $0x8] sm:$0xff] (%p3189_p13)  }
 0x1ca   : > { %2670 = vst.msk [vmem:[%s3297_s29 + $0xb8] sm:$0xf] %vm722_vm0, %v1093_v61  ;;  %v1416_v61 = vld [vmem:[%s3288_s4 + $0x10] sm:$0xff] (%p3189_p13)  }
 0x1cb   : > { %2671 = vst.msk [vmem:[%s3297_s29 + $0xbc] sm:$0xf] %vm722_vm0, %v1094_v62  ;;  %v1420_v62 = vld [vmem:[%s3288_s4 + $0x18] sm:$0xff] (%p3189_p13)  }
 0x1cc   : > { %2702 = vst.msk [vmem:[%s3288_s4 + $0xf8] sm:$0xf] %vm722_vm0, %v1222_v63  ;;  %v1424_v63 = vld [vmem:[%s3288_s4 + $0x20] sm:$0xff] (%p3189_p13)  }
 0x1cd   : > { %2718 = vst.msk [vmem:[%s3297_s29 + $0xf8] sm:$0xf] %vm722_vm0, %v1272_v0  ;;  %1335 = vrot.lane.b32.xlu1 %v3708_v10, %s3073_s5  ;;  %1337 = vrot.lane.b32.xlu2 %v3736_v22, %s3073_s5  ;;  %v1428_v0 = vld [vmem:[%s3288_s4 + $0x28] sm:$0xff] (%p3189_p13)  }
 0x1ce   : > { %1333 = vrot.lane.b32.xlu0 %v3619_v41, %s3073_s5  ;;  %1409 = vst [vmem:[%s4011_s7] sm:$0xff] (%p3189_p13), %v1408_v59  }
 0x1cf   : > { %v834_v1 = vpop.permute.xlu1 %833  ;;  %v836_v2 = vpop.permute.xlu2 %835  ;;  %1413 = vst [vmem:[%s4011_s7 + $0x8] sm:$0xff] (%p3189_p13), %v1412_v60  }
 0x1d0   : > { %2599 = vst.msk [vmem:[%s3288_s4 + $0x5c] sm:$0xf] %vm722_vm0, %v834_v1  ;;  %v891_v3 = vrot.slane %v834_v1, 4  ;;  %v892_v4 = vrot.slane %v836_v2, 4  ;;  %v1029_v5 = vpop.permute.xlu0 %1028  ;;  %v1432_v1 = vld [vmem:[%s3288_s4 + $0x30] sm:$0xff] (%p3189_p13)  }
 0x1d1   : > { %2600 = vst.msk [vmem:[%s3288_s4 + $0x60] sm:$0xf] %vm722_vm0, %v836_v2  ;;  %v1086_v6 = vrot.slane %v1029_v5, 4  ;;  %v1436_v2 = vld [vmem:[%s3288_s4 + $0x38] sm:$0xff] (%p3189_p13)  }
 0x1d2   : > { %2615 = vst.msk [vmem:[%s3297_s29 + $0x5c] sm:$0xf] %vm722_vm0, %v891_v3  ;;  %v1440_v3 = vld [vmem:[%s3288_s4 + $0x40] sm:$0xff] (%p3189_p13)  }
 0x1d3   : > { %2616 = vst.msk [vmem:[%s3297_s29 + $0x60] sm:$0xf] %vm722_vm0, %v892_v4  ;;  %v1444_v4 = vld [vmem:[%s3288_s4 + $0x48] sm:$0xff] (%p3189_p13)  }
 0x1d4   : > { %2647 = vst.msk [vmem:[%s3288_s4 + $0x9c] sm:$0xf] %vm722_vm0, %v1029_v5  ;;  %v1448_v5 = vld [vmem:[%s3288_s4 + $0x50] sm:$0xff] (%p3189_p13)  }
 0x1d5   : > { %2663 = vst.msk [vmem:[%s3297_s29 + $0x9c] sm:$0xf] %vm722_vm0, %v1086_v6 }
 0x1d6   : > { %1417 = vst [vmem:[%s4011_s7 + $0x10] sm:$0xff] (%p3189_p13), %v1416_v61  }
 0x1d7   : > { %v1143_v41 = vpop.permute.xlu1 %1142  ;;  %v1145_v9 = vpop.permute.xlu2 %1144  ;;  %1421 = vst [vmem:[%s4011_s7 + $0x18] sm:$0xff] (%p3189_p13), %v1420_v62   ;;  %v1452_v6 = vld [vmem:[%s3288_s4 + $0x58] sm:$0xff] (%p3189_p13)  }
 0x1d8   : > { %2679 = vst.msk [vmem:[%s3304_s30 + $0x9c] sm:$0xf] %vm722_vm0, %v1143_v41  ;;  %v850_v16 = vpop.permute.xlu0 %849 }
 0x1d9   : > { %2680 = vst.msk [vmem:[%s3304_s30 + $0xa0] sm:$0xf] %vm722_vm0, %v1145_v9  ;;  %v899_v17 = vrot.slane %v850_v16, 4 }
 0x1da   : > { %2607 = vst.msk [vmem:[%s3288_s4 + $0x7c] sm:$0xf] %vm722_vm0, %v850_v16  ;;  %v1464_v16 = vld [vmem:[%s3288_s4 + $0x70] sm:$0xff] (%p3189_p13)  }
 0x1db   : > { %2623 = vst.msk [vmem:[%s3297_s29 + $0x7c] sm:$0xf] %vm722_vm0, %v899_v17 }
 0x1dc   : > { %1425 = vst [vmem:[%s4011_s7 + $0x20] sm:$0xff] (%p3189_p13), %v1424_v63  }
 0x1dd   : > { %1429 = vst [vmem:[%s4011_s7 + $0x28] sm:$0xff] (%p3189_p13), %v1428_v0  }
 0x1de   : > { %1433 = vst [vmem:[%s4011_s7 + $0x30] sm:$0xff] (%p3189_p13), %v1432_v1  }
 0x1df   : > { %v1224_v10 = vpop.permute.xlu1 %1223  ;;  %v1332_v11 = vpop.permute.xlu2 %1331  ;;  %1437 = vst [vmem:[%s4011_s7 + $0x38] sm:$0xff] (%p3189_p13), %v1436_v2  }
 0x1e0   : > { %2703 = vst.msk [vmem:[%s3288_s4 + $0xfc] sm:$0xf] %vm722_vm0, %v1224_v10  ;;  %v1273_v12 = vrot.slane %v1224_v10, 4  ;;  %v1322_v13 = vpop.permute.xlu0 %1321  ;;  %v1472_v10 = vld [vmem:[%s3288_s4 + $0x80] sm:$0xff] (%p3189_p13)  }
 0x1e1   : > { %2732 = vst.msk [vmem:[%s3304_s30 + $0xf0] sm:$0xf] %vm722_vm0, %v1332_v11  ;;  %v1468_v17 = vld [vmem:[%s3288_s4 + $0x78] sm:$0xff] (%p3189_p13)   ;;  %v1476_v11 = vld [vmem:[%s3288_s4 + $0x88] sm:$0xff] (%p3189_p13)  }
 0x1e2   : > { %2719 = vst.msk [vmem:[%s3297_s29 + $0xfc] sm:$0xf] %vm722_vm0, %v1273_v12  ;;  %v1480_v12 = vld [vmem:[%s3288_s4 + $0x90] sm:$0xff] (%p3189_p13)  }
 0x1e3   : > { %2727 = vst.msk [vmem:[%s3304_s30 + $0xdc] sm:$0xf] %vm722_vm0, %v1322_v13  ;;  %v1484_v13 = vld [vmem:[%s3288_s4 + $0x98] sm:$0xff] (%p3189_p13)  }
 0x1e4   : > { %1441 = vst [vmem:[%s4011_s7 + $0x100] sm:$0xff] (%p3189_p13), %v1440_v3  }
 0x1e5   : > { %1445 = vst [vmem:[%s4011_s7 + $0x108] sm:$0xff] (%p3189_p13), %v1444_v4  }
 0x1e6   : > { %1449 = vst [vmem:[%s4011_s7 + $0x110] sm:$0xff] (%p3189_p13), %v1448_v5  }
 0x1e7   : > { %v1031_v7 = vpop.permute.xlu1 %1030  ;;  %v1033_v14 = vpop.permute.xlu2 %1032  ;;  %1453 = vst [vmem:[%s4011_s7 + $0x118] sm:$0xff] (%p3189_p13), %v1452_v6  }
 0x1e8   : > { %2648 = vst.msk [vmem:[%s3288_s4 + $0xa0] sm:$0xf] %vm722_vm0, %v1031_v7  ;;  %v1087_v8 = vrot.slane %v1031_v7, 4  ;;  %v1088_v15 = vrot.slane %v1033_v14, 4  ;;  %v1210_v18 = vpop.permute.xlu0 %1209 }
 0x1e9   : > { %2649 = vst.msk [vmem:[%s3288_s4 + $0xa4] sm:$0xf] %vm722_vm0, %v1033_v14  ;;  %v1266_v19 = vrot.slane %v1210_v18, 4 }
 0x1ea   : > { %2664 = vst.msk [vmem:[%s3297_s29 + $0xa0] sm:$0xf] %vm722_vm0, %v1087_v8  ;;  %v1496_v8 = vld [vmem:[%s3288_s4 + $0xb0] sm:$0xff] (%p3189_p13)  }
 0x1eb   : > { %2665 = vst.msk [vmem:[%s3297_s29 + $0xa4] sm:$0xf] %vm722_vm0, %v1088_v15  ;;  %v1500_v15 = vld [vmem:[%s3288_s4 + $0xb8] sm:$0xff] (%p3189_p13)  }
 0x1ec   : > { %2696 = vst.msk [vmem:[%s3288_s4 + $0xe0] sm:$0xf] %vm722_vm0, %v1210_v18  ;;  %v1504_v18 = vld [vmem:[%s3288_s4 + $0xc0] sm:$0xff] (%p3189_p13)  }
 0x1ed   : > { %2712 = vst.msk [vmem:[%s3297_s29 + $0xe0] sm:$0xf] %vm722_vm0, %v1266_v19  ;;  %v1508_v19 = vld [vmem:[%s3288_s4 + $0xc8] sm:$0xff] (%p3189_p13)  }
 0x1ee   : > { %1465 = vst [vmem:[%s4011_s7 + $0x130] sm:$0xff] (%p3189_p13), %v1464_v16  }
 0x1ef   : > { %v974_v21 = vpop.permute.xlu1 %973  ;;  %v976_v22 = vpop.permute.xlu2 %975  ;;  %1469 = vst [vmem:[%s4011_s7 + $0x138] sm:$0xff] (%p3189_p13), %v1468_v17  }
 0x1f0   : > { %2636 = vst.msk [vmem:[%s3304_s30 + $0x70] sm:$0xf] %vm722_vm0, %v974_v21  ;;  %v966_v24 = vpop.permute.xlu0 %965  ;;  %v1488_v7 = vld [vmem:[%s3288_s4 + $0xa0] sm:$0xff] (%p3189_p13)   ;;  %v1512_v21 = vld [vmem:[%s3288_s4 + $0xd0] sm:$0xff] (%p3189_p13)  }
 0x1f1   : > { %2637 = vst.msk [vmem:[%s3304_s30 + $0x74] sm:$0xf] %vm722_vm0, %v976_v22  ;;  %v1516_v22 = vld [vmem:[%s3288_s4 + $0xd8] sm:$0xff] (%p3189_p13)  }
 0x1f2   : > { %2632 = vst.msk [vmem:[%s3304_s30 + $0x60] sm:$0xf] %vm722_vm0, %v966_v24 }
 0x1f3   : > { %1473 = vst [vmem:[%s4011_s7 + $0x200] sm:$0xff] (%p3189_p13), %v1472_v10  }
 0x1f4   : > { %1477 = vst [vmem:[%s4011_s7 + $0x208] sm:$0xff] (%p3189_p13), %v1476_v11  }
 0x1f5   : > { %1481 = vst [vmem:[%s4011_s7 + $0x210] sm:$0xff] (%p3189_p13), %v1480_v12  }
 0x1f6   : > { %1485 = vst [vmem:[%s4011_s7 + $0x218] sm:$0xff] (%p3189_p13), %v1484_v13  }
 0x1f7   : > { %v1324_v25 = vpop.permute.xlu1 %1323  ;;  %v1326_v26 = vpop.permute.xlu2 %1325  ;;  %1489 = vst [vmem:[%s4011_s7 + $0x220] sm:$0xff] (%p3189_p13), %v1488_v7  }
 0x1f8   : > { %2728 = vst.msk [vmem:[%s3304_s30 + $0xe0] sm:$0xf] %vm722_vm0, %v1324_v25  ;;  %v1153_v27 = vpop.permute.xlu0 %1152 }
 0x1f9   : > { %2729 = vst.msk [vmem:[%s3304_s30 + $0xe4] sm:$0xf] %vm722_vm0, %v1326_v26  ;;  %v1528_v26 = vld [vmem:[%s3288_s4 + $0xf0] sm:$0xff] (%p3189_p13)  }
 0x1fa   : > { %2684 = vst.msk [vmem:[%s3304_s30 + $0xb0] sm:$0xf] %vm722_vm0, %v1153_v27  ;;  %v1532_v27 = vld [vmem:[%s3288_s4 + $0xf8] sm:$0xff] (%p3189_p13)  }
 0x1fb   : > { %1497 = vst [vmem:[%s4011_s7 + $0x230] sm:$0xff] (%p3189_p13), %v1496_v8  }
 0x1fc   : > { %1501 = vst [vmem:[%s4011_s7 + $0x238] sm:$0xff] (%p3189_p13), %v1500_v15  }
 0x1fd   : > { %1505 = vst [vmem:[%s4011_s7 + $0x300] sm:$0xff] (%p3189_p13), %v1504_v18  }
 0x1fe   : > { %1509 = vst [vmem:[%s4011_s7 + $0x308] sm:$0xff] (%p3189_p13), %v1508_v19  }
 0x1ff   : > { %v1212_v28 = vpop.permute.xlu1 %1211  ;;  %v1214_v29 = vpop.permute.xlu2 %1213  ;;  %1513 = vst [vmem:[%s4011_s7 + $0x310] sm:$0xff] (%p3189_p13), %v1512_v21  }
 0x200   : > { %2697 = vst.msk [vmem:[%s3288_s4 + $0xe4] sm:$0xf] %vm722_vm0, %v1212_v28  ;;  %v1267_v23 = vrot.slane %v1212_v28, 4  ;;  %v1268_v20 = vrot.slane %v1214_v29, 4  ;;  %v838_v30 = vpop.permute.xlu0 %837 }
 0x201   : > { %2698 = vst.msk [vmem:[%s3288_s4 + $0xe8] sm:$0xf] %vm722_vm0, %v1214_v29  ;;  %v893_v31 = vrot.slane %v838_v30, 4 }
 0x202   : > { %2713 = vst.msk [vmem:[%s3297_s29 + $0xe4] sm:$0xf] %vm722_vm0, %v1267_v23 }
 0x203   : > { %2714 = vst.msk [vmem:[%s3297_s29 + $0xe8] sm:$0xf] %vm722_vm0, %v1268_v20 }
 0x204   : > { %2601 = vst.msk [vmem:[%s3288_s4 + $0x64] sm:$0xf] %vm722_vm0, %v838_v30 }
 0x205   : > { %2617 = vst.msk [vmem:[%s3297_s29 + $0x64] sm:$0xf] %vm722_vm0, %v893_v31 }
 0x206   : > { %1517 = vst [vmem:[%s4011_s7 + $0x318] sm:$0xff] (%p3189_p13), %v1516_v22  }
 0x207   : > { %v968_v32 = vpop.permute.xlu1 %967  ;;  %v970_v33 = vpop.permute.xlu2 %969  ;;  %v1520_v24 = vld [vmem:[%s3288_s4 + $0xe0] sm:$0xff] (%p3189_p13)   ;;  %1529 = vst [vmem:[%s4011_s7 + $0x330] sm:$0xff] (%p3189_p13), %v1528_v26  }
 0x208   : > { %2633 = vst.msk [vmem:[%s3304_s30 + $0x64] sm:$0xf] %vm722_vm0, %v968_v32  ;;  %v1147_v34 = vpop.permute.xlu0 %1146 }
 0x209   : > { %2634 = vst.msk [vmem:[%s3304_s30 + $0x68] sm:$0xf] %vm722_vm0, %v970_v33 }
 0x20a   : > { %2681 = vst.msk [vmem:[%s3304_s30 + $0xa4] sm:$0xf] %vm722_vm0, %v1147_v34 }
 0x20b   : > { %v1456_v41 = vld [vmem:[%s3288_s4 + $0x60] sm:$0xff] (%p3189_p13)   ;;  %1521 = vst [vmem:[%s4011_s7 + $0x320] sm:$0xff] (%p3189_p13), %v1520_v24  }
 0x20c   : > { %1457 = vst [vmem:[%s4011_s7 + $0x120] sm:$0xff] (%p3189_p13), %v1456_v41  }
 0x20d   : > { %1533 = vst [vmem:[%s4011_s7 + $0x338] sm:$0xff] (%p3189_p13), %v1532_v27  }
 0x20f   : > { %v1155_v36 = vpop.permute.xlu1 %1154  ;;  %v1157_v37 = vpop.permute.xlu2 %1156 }
 0x210   : > { %2685 = vst.msk [vmem:[%s3304_s30 + $0xb4] sm:$0xf] %vm722_vm0, %v1155_v36  ;;  %v1035_v38 = vpop.permute.xlu0 %1034 }
 0x211   : > { %2686 = vst.msk [vmem:[%s3304_s30 + $0xb8] sm:$0xf] %vm722_vm0, %v1157_v37  ;;  %v1089_v39 = vrot.slane %v1035_v38, 4 }
 0x212   : > { %2650 = vst.msk [vmem:[%s3288_s4 + $0xa8] sm:$0xf] %vm722_vm0, %v1035_v38 }
 0x213   : > { %2666 = vst.msk [vmem:[%s3297_s29 + $0xa8] sm:$0xf] %vm722_vm0, %v1089_v39 }
 0x217   : > { %v840_v42 = vpop.permute.xlu1 %839  ;;  %v842_v40 = vpop.permute.xlu2 %841 }
 0x218   : > { %2602 = vst.msk [vmem:[%s3288_s4 + $0x68] sm:$0xf] %vm722_vm0, %v840_v42  ;;  %v894_v43 = vrot.slane %v840_v42, 4  ;;  %v895_v44 = vrot.slane %v842_v40, 4  ;;  %v978_v45 = vpop.permute.xlu0 %977 }
 0x219   : > { %2603 = vst.msk [vmem:[%s3288_s4 + $0x6c] sm:$0xf] %vm722_vm0, %v842_v40 }
 0x21a   : > { %2618 = vst.msk [vmem:[%s3297_s29 + $0x68] sm:$0xf] %vm722_vm0, %v894_v43 }
 0x21b   : > { %2619 = vst.msk [vmem:[%s3297_s29 + $0x6c] sm:$0xf] %vm722_vm0, %v895_v44 }
 0x21c   : > { %2638 = vst.msk [vmem:[%s3304_s30 + $0x78] sm:$0xf] %vm722_vm0, %v978_v45 }
 0x21f   : > { %v1149_v46 = vpop.permute.xlu1 %1148  ;;  %v1151_v47 = vpop.permute.xlu2 %1150 }
 0x220   : > { %2682 = vst.msk [vmem:[%s3304_s30 + $0xa8] sm:$0xf] %vm722_vm0, %v1149_v46  ;;  %v1328_v48 = vpop.permute.xlu0 %1327  ;;  %v1460_v9 = vld [vmem:[%s3288_s4 + $0x68] sm:$0xff] (%p3189_p13)  }
 0x221   : > { %2683 = vst.msk [vmem:[%s3304_s30 + $0xac] sm:$0xf] %vm722_vm0, %v1151_v47 }
 0x222   : > { %2730 = vst.msk [vmem:[%s3304_s30 + $0xe8] sm:$0xf] %vm722_vm0, %v1328_v48 }
 0x223   : > { %1461 = vst [vmem:[%s4011_s7 + $0x128] sm:$0xff] (%p3189_p13), %v1460_v9  }
 0x227   : > { %v1037_v49 = vpop.permute.xlu1 %1036  ;;  %v1338_v50 = vpop.permute.xlu2 %1337 }
 0x228   : > { %2651 = vst.msk [vmem:[%s3288_s4 + $0xac] sm:$0xf] %vm722_vm0, %v1037_v49  ;;  %v1090_v51 = vrot.slane %v1037_v49, 4  ;;  %v1216_v52 = vpop.permute.xlu0 %1215 }
 0x229   : > { %2735 = vst.msk [vmem:[%s3304_s30 + $0xfc] sm:$0xf] %vm722_vm0, %v1338_v50  ;;  %v1269_v35 = vrot.slane %v1216_v52, 4 }
 0x22a   : > { %2667 = vst.msk [vmem:[%s3297_s29 + $0xac] sm:$0xf] %vm722_vm0, %v1090_v51 }
 0x22b   : > { %2699 = vst.msk [vmem:[%s3288_s4 + $0xec] sm:$0xf] %vm722_vm0, %v1216_v52 }
 0x22c   : > { %2715 = vst.msk [vmem:[%s3297_s29 + $0xec] sm:$0xf] %vm722_vm0, %v1269_v35 }
 0x22f   : > { %v980_v53 = vpop.permute.xlu1 %979  ;;  %v1492_v14 = vld [vmem:[%s3288_s4 + $0xa8] sm:$0xff] (%p3189_p13)  }
 0x230   : > { %2639 = vst.msk [vmem:[%s3304_s30 + $0x7c] sm:$0xf] %vm722_vm0, %v980_v53  ;;  %v972_v54 = vpop.permute.xlu0 %971 }
 0x231   : > { %2635 = vst.msk [vmem:[%s3304_s30 + $0x6c] sm:$0xf] %vm722_vm0, %v972_v54 }
 0x232   : > { %1493 = vst [vmem:[%s4011_s7 + $0x228] sm:$0xff] (%p3189_p13), %v1492_v14   ;;  %v1524_v25 = vld [vmem:[%s3288_s4 + $0xe8] sm:$0xff] (%p3189_p13)  }
 0x233   : > { %1525 = vst [vmem:[%s4011_s7 + $0x328] sm:$0xff] (%p3189_p13), %v1524_v25  }
 0x237   : > { %v1330_v55 = vpop.permute.xlu1 %1329 }
 0x238   : > { %2731 = vst.msk [vmem:[%s3304_s30 + $0xec] sm:$0xf] %vm722_vm0, %v1330_v55  ;;  %v1159_v56 = vpop.permute.xlu0 %1158 }
 0x239   : > { %2687 = vst.msk [vmem:[%s3304_s30 + $0xbc] sm:$0xf] %vm722_vm0, %v1159_v56 }
 0x23d   : > { %1386 = sbr.rel (!%p3189_p13) target bundleno = 578 (0x242), region = 48 }
 0x23f   : > { %v1336_v57 = vpop.permute.xlu1 %1335 }
 0x240   : > { %2734 = vst.msk [vmem:[%s3304_s30 + $0xf8] sm:$0xf] %vm722_vm0, %v1336_v57  ;;  %v1334_v58 = vpop.permute.xlu0 %1333 }
 0x241   : > { %2733 = vst.msk [vmem:[%s3304_s30 + $0xf4] sm:$0xf] %vm722_vm0, %v1334_v58 }
 0x242 PF: > { %1687 = sbr.rel (!%p3189_p13) target bundleno = 618 (0x26a), region = 89  ;;  %s2742_s12 = sshll.u32 (%p3189_p13), %s3049_s21, 4  ;;  %v1709_v28 = vld [vmem:[%s3297_s29] sm:$0xff] (%p3189_p13)   ;;  %v1713_v29 = vld [vmem:[%s3297_s29 + $0x8] sm:$0xff] (%p3189_p13)   ;;  %v1717_v23 = vld [vmem:[%s3297_s29 + $0x10] sm:$0xff] (%p3189_p13)  }
 0x243   : > { %s2743_s13 = sshll.u32 (%p3189_p13), %s3053_s22, 8  ;;  %s4267_s2 = sld [smem:[#allocation16_spill]] (%p3189_p13)  ;;  %v1721_v20 = vld [vmem:[%s3297_s29 + $0x18] sm:$0xff] (%p3189_p13)   ;;  %v1725_v30 = vld [vmem:[%s3297_s29 + $0x20] sm:$0xff] (%p3189_p13)   ;;  %v1729_v31 = vld [vmem:[%s3297_s29 + $0x28] sm:$0xff] (%p3189_p13)  }
 0x244   : > { %s1690_s6 = sadd.s32 (%p3189_p13), %s2743_s13, %s2742_s12  ;;  %v1733_v32 = vld [vmem:[%s3297_s29 + $0x30] sm:$0xff] (%p3189_p13)   ;;  %v1737_v33 = vld [vmem:[%s3297_s29 + $0x38] sm:$0xff] (%p3189_p13)   ;;  %v1741_v34 = vld [vmem:[%s3297_s29 + $0x40] sm:$0xff] (%p3189_p13)  }
 0x245   : > { %s2744_s1 = sshll.u32 (%p3189_p13), %s1690_s6, 2  ;;  %v1745_v36 = vld [vmem:[%s3297_s29 + $0x48] sm:$0xff] (%p3189_p13)   ;;  %v1749_v37 = vld [vmem:[%s3297_s29 + $0x50] sm:$0xff] (%p3189_p13)   ;;  %v1753_v38 = vld [vmem:[%s3297_s29 + $0x58] sm:$0xff] (%p3189_p13)  }
 0x246   : > { %v1757_v39 = vld [vmem:[%s3297_s29 + $0x60] sm:$0xff] (%p3189_p13)   ;;  %v1761_v42 = vld [vmem:[%s3297_s29 + $0x68] sm:$0xff] (%p3189_p13)   ;;  %v1765_v40 = vld [vmem:[%s3297_s29 + $0x70] sm:$0xff] (%p3189_p13)  }
 0x247   : > { %v1769_v43 = vld [vmem:[%s3297_s29 + $0x78] sm:$0xff]   ;;  %v1773_v44 = vld [vmem:[%s3297_s29 + $0x80] sm:$0xff]   ;;  %v1777_v45 = vld [vmem:[%s3297_s29 + $0x88] sm:$0xff]  }
 0x248   : > { %v1781_v46 = vld [vmem:[%s3297_s29 + $0x90] sm:$0xff]   ;;  %v1785_v47 = vld [vmem:[%s3297_s29 + $0x98] sm:$0xff]   ;;  %v1789_v48 = vld [vmem:[%s3297_s29 + $0xa0] sm:$0xff]  }
 0x249   : > { %s4084_s4 = scalar_lea.vmem %s4267_s2, %s2744_s1  ;;  %v1793_v49 = vld [vmem:[%s3297_s29 + $0xa8] sm:$0xff]   ;;  %v1797_v50 = vld [vmem:[%s3297_s29 + $0xb0] sm:$0xff]   ;;  %v1801_v51 = vld [vmem:[%s3297_s29 + $0xb8] sm:$0xff]  }
 0x24a   : > { %1710 = vst [vmem:[%s4084_s4] sm:$0xff] %v1709_v28   ;;  %v1805_v52 = vld [vmem:[%s3297_s29 + $0xc0] sm:$0xff]   ;;  %v1809_v35 = vld [vmem:[%s3297_s29 + $0xc8] sm:$0xff]   ;;  %v1813_v53 = vld [vmem:[%s3297_s29 + $0xd0] sm:$0xff]  }
 0x24b   : > { %1714 = vst [vmem:[%s4084_s4 + $0x8] sm:$0xff] %v1713_v29   ;;  %v1817_v54 = vld [vmem:[%s3297_s29 + $0xd8] sm:$0xff]   ;;  %v1821_v55 = vld [vmem:[%s3297_s29 + $0xe0] sm:$0xff]   ;;  %v1825_v56 = vld [vmem:[%s3297_s29 + $0xe8] sm:$0xff]  }
 0x24c   : > { %1718 = vst [vmem:[%s4084_s4 + $0x10] sm:$0xff] %v1717_v23   ;;  %v1829_v57 = vld [vmem:[%s3297_s29 + $0xf0] sm:$0xff]   ;;  %v1833_v58 = vld [vmem:[%s3297_s29 + $0xf8] sm:$0xff]  }
 0x24d   : > { %1722 = vst [vmem:[%s4084_s4 + $0x18] sm:$0xff] %v1721_v20  }
 0x24e   : > { %1726 = vst [vmem:[%s4084_s4 + $0x20] sm:$0xff] %v1725_v30  }
 0x24f   : > { %1730 = vst [vmem:[%s4084_s4 + $0x28] sm:$0xff] %v1729_v31  }
 0x250   : > { %1734 = vst [vmem:[%s4084_s4 + $0x30] sm:$0xff] %v1733_v32  }
 0x251   : > { %1738 = vst [vmem:[%s4084_s4 + $0x38] sm:$0xff] %v1737_v33  }
 0x252   : > { %1742 = vst [vmem:[%s4084_s4 + $0x100] sm:$0xff] %v1741_v34  }
 0x253   : > { %1746 = vst [vmem:[%s4084_s4 + $0x108] sm:$0xff] %v1745_v36  }
 0x254   : > { %1750 = vst [vmem:[%s4084_s4 + $0x110] sm:$0xff] %v1749_v37  }
 0x255   : > { %1754 = vst [vmem:[%s4084_s4 + $0x118] sm:$0xff] %v1753_v38  }
 0x256   : > { %1758 = vst [vmem:[%s4084_s4 + $0x120] sm:$0xff] %v1757_v39  }
 0x257   : > { %1762 = vst [vmem:[%s4084_s4 + $0x128] sm:$0xff] %v1761_v42  }
 0x258   : > { %1766 = vst [vmem:[%s4084_s4 + $0x130] sm:$0xff] %v1765_v40  }
 0x259   : > { %1770 = vst [vmem:[%s4084_s4 + $0x138] sm:$0xff] %v1769_v43  }
 0x25a   : > { %1774 = vst [vmem:[%s4084_s4 + $0x200] sm:$0xff] %v1773_v44  }
 0x25b   : > { %1778 = vst [vmem:[%s4084_s4 + $0x208] sm:$0xff] %v1777_v45  }
 0x25c   : > { %1782 = vst [vmem:[%s4084_s4 + $0x210] sm:$0xff] %v1781_v46  }
 0x25d   : > { %1786 = vst [vmem:[%s4084_s4 + $0x218] sm:$0xff] %v1785_v47  }
 0x25e   : > { %1790 = vst [vmem:[%s4084_s4 + $0x220] sm:$0xff] %v1789_v48  }
 0x25f   : > { %1794 = vst [vmem:[%s4084_s4 + $0x228] sm:$0xff] %v1793_v49  }
 0x260   : > { %1798 = vst [vmem:[%s4084_s4 + $0x230] sm:$0xff] %v1797_v50  }
 0x261   : > { %1802 = vst [vmem:[%s4084_s4 + $0x238] sm:$0xff] %v1801_v51  }
 0x262   : > { %1806 = vst [vmem:[%s4084_s4 + $0x300] sm:$0xff] %v1805_v52  }
 0x263   : > { %1810 = vst [vmem:[%s4084_s4 + $0x308] sm:$0xff] %v1809_v35  }
 0x264   : > { %1814 = vst [vmem:[%s4084_s4 + $0x310] sm:$0xff] %v1813_v53  }
 0x265   : > { %1818 = vst [vmem:[%s4084_s4 + $0x318] sm:$0xff] %v1817_v54  }
 0x266   : > { %1822 = vst [vmem:[%s4084_s4 + $0x320] sm:$0xff] %v1821_v55  }
 0x267   : > { %1826 = vst [vmem:[%s4084_s4 + $0x328] sm:$0xff] %v1825_v56  }
 0x268   : > { %1830 = vst [vmem:[%s4084_s4 + $0x330] sm:$0xff] %v1829_v57  }
 0x269   : > { %1834 = vst [vmem:[%s4084_s4 + $0x338] sm:$0xff] %v1833_v58  }
 0x26a PF: > { %1988 = sbr.rel (!%p3189_p13) target bundleno = 658 (0x292), region = 130  ;;  %s2745_s5 = sshll.u32 (%p3189_p13), %s3049_s21, 4  ;;  %v2010_v59 = vld [vmem:[%s3304_s30] sm:$0xff] (%p3189_p13)   ;;  %v2014_v60 = vld [vmem:[%s3304_s30 + $0x8] sm:$0xff] (%p3189_p13)   ;;  %v2018_v61 = vld [vmem:[%s3304_s30 + $0x10] sm:$0xff] (%p3189_p13)  }
 0x26b   : > { %s2746_s23 = sshll.u32 (%p3189_p13), %s3053_s22, 8  ;;  %s4268_s10 = sld [smem:[#allocation17_spill]] (%p3189_p13)  ;;  %v2022_v62 = vld [vmem:[%s3304_s30 + $0x18] sm:$0xff] (%p3189_p13)   ;;  %v2026_v63 = vld [vmem:[%s3304_s30 + $0x20] sm:$0xff] (%p3189_p13)   ;;  %v2030_v0 = vld [vmem:[%s3304_s30 + $0x28] sm:$0xff] (%p3189_p13)  }
 0x26c   : > { %s1991_s27 = sadd.s32 (%p3189_p13), %s2746_s23, %s2745_s5  ;;  %v2034_v1 = vld [vmem:[%s3304_s30 + $0x30] sm:$0xff] (%p3189_p13)   ;;  %v2038_v2 = vld [vmem:[%s3304_s30 + $0x38] sm:$0xff] (%p3189_p13)   ;;  %v2042_v3 = vld [vmem:[%s3304_s30 + $0x40] sm:$0xff] (%p3189_p13)  }
 0x26d   : > { %s2747_s29 = sshll.u32 (%p3189_p13), %s1991_s27, 2  ;;  %v2046_v4 = vld [vmem:[%s3304_s30 + $0x48] sm:$0xff] (%p3189_p13)   ;;  %v2050_v5 = vld [vmem:[%s3304_s30 + $0x50] sm:$0xff] (%p3189_p13)   ;;  %v2054_v6 = vld [vmem:[%s3304_s30 + $0x58] sm:$0xff] (%p3189_p13)  }
 0x26e   : > { %v2058_v41 = vld [vmem:[%s3304_s30 + $0x60] sm:$0xff] (%p3189_p13)   ;;  %v2062_v9 = vld [vmem:[%s3304_s30 + $0x68] sm:$0xff] (%p3189_p13)   ;;  %v2066_v16 = vld [vmem:[%s3304_s30 + $0x70] sm:$0xff] (%p3189_p13)  }
 0x26f   : > { %v2070_v17 = vld [vmem:[%s3304_s30 + $0x78] sm:$0xff]   ;;  %v2074_v10 = vld [vmem:[%s3304_s30 + $0x80] sm:$0xff]   ;;  %v2078_v11 = vld [vmem:[%s3304_s30 + $0x88] sm:$0xff]  }
 0x270   : > { %v2082_v12 = vld [vmem:[%s3304_s30 + $0x90] sm:$0xff]   ;;  %v2086_v13 = vld [vmem:[%s3304_s30 + $0x98] sm:$0xff]   ;;  %v2090_v7 = vld [vmem:[%s3304_s30 + $0xa0] sm:$0xff]  }
 0x271   : > { %s4157_s14 = scalar_lea.vmem %s4268_s10, %s2747_s29  ;;  %v2094_v14 = vld [vmem:[%s3304_s30 + $0xa8] sm:$0xff]   ;;  %v2098_v8 = vld [vmem:[%s3304_s30 + $0xb0] sm:$0xff]   ;;  %v2102_v15 = vld [vmem:[%s3304_s30 + $0xb8] sm:$0xff]  }
 0x272   : > { %2011 = vst [vmem:[%s4157_s14] sm:$0xff] %v2010_v59   ;;  %v2106_v18 = vld [vmem:[%s3304_s30 + $0xc0] sm:$0xff]   ;;  %v2110_v19 = vld [vmem:[%s3304_s30 + $0xc8] sm:$0xff]   ;;  %v2114_v21 = vld [vmem:[%s3304_s30 + $0xd0] sm:$0xff]  }
 0x273   : > { %2015 = vst [vmem:[%s4157_s14 + $0x8] sm:$0xff] %v2014_v60   ;;  %v2118_v22 = vld [vmem:[%s3304_s30 + $0xd8] sm:$0xff]   ;;  %v2122_v24 = vld [vmem:[%s3304_s30 + $0xe0] sm:$0xff]   ;;  %v2126_v25 = vld [vmem:[%s3304_s30 + $0xe8] sm:$0xff]  }
 0x274   : > { %2019 = vst [vmem:[%s4157_s14 + $0x10] sm:$0xff] %v2018_v61   ;;  %v2130_v26 = vld [vmem:[%s3304_s30 + $0xf0] sm:$0xff]   ;;  %v2134_v27 = vld [vmem:[%s3304_s30 + $0xf8] sm:$0xff]  }
 0x275   : > { %2023 = vst [vmem:[%s4157_s14 + $0x18] sm:$0xff] %v2022_v62  }
 0x276   : > { %2027 = vst [vmem:[%s4157_s14 + $0x20] sm:$0xff] %v2026_v63  }
 0x277   : > { %2031 = vst [vmem:[%s4157_s14 + $0x28] sm:$0xff] %v2030_v0  }
 0x278   : > { %2035 = vst [vmem:[%s4157_s14 + $0x30] sm:$0xff] %v2034_v1  }
 0x279   : > { %2039 = vst [vmem:[%s4157_s14 + $0x38] sm:$0xff] %v2038_v2  }
 0x27a   : > { %2043 = vst [vmem:[%s4157_s14 + $0x100] sm:$0xff] %v2042_v3  }
 0x27b   : > { %2047 = vst [vmem:[%s4157_s14 + $0x108] sm:$0xff] %v2046_v4  }
 0x27c   : > { %2051 = vst [vmem:[%s4157_s14 + $0x110] sm:$0xff] %v2050_v5  }
 0x27d   : > { %2055 = vst [vmem:[%s4157_s14 + $0x118] sm:$0xff] %v2054_v6  }
 0x27e   : > { %2059 = vst [vmem:[%s4157_s14 + $0x120] sm:$0xff] %v2058_v41  }
 0x27f   : > { %2063 = vst [vmem:[%s4157_s14 + $0x128] sm:$0xff] %v2062_v9  }
 0x280   : > { %2067 = vst [vmem:[%s4157_s14 + $0x130] sm:$0xff] %v2066_v16  }
 0x281   : > { %2071 = vst [vmem:[%s4157_s14 + $0x138] sm:$0xff] %v2070_v17  }
 0x282   : > { %2075 = vst [vmem:[%s4157_s14 + $0x200] sm:$0xff] %v2074_v10  }
 0x283   : > { %2079 = vst [vmem:[%s4157_s14 + $0x208] sm:$0xff] %v2078_v11  }
 0x284   : > { %2083 = vst [vmem:[%s4157_s14 + $0x210] sm:$0xff] %v2082_v12  }
 0x285   : > { %2087 = vst [vmem:[%s4157_s14 + $0x218] sm:$0xff] %v2086_v13  }
 0x286   : > { %2091 = vst [vmem:[%s4157_s14 + $0x220] sm:$0xff] %v2090_v7  }
 0x287   : > { %2095 = vst [vmem:[%s4157_s14 + $0x228] sm:$0xff] %v2094_v14  }
 0x288   : > { %2099 = vst [vmem:[%s4157_s14 + $0x230] sm:$0xff] %v2098_v8  }
 0x289   : > { %2103 = vst [vmem:[%s4157_s14 + $0x238] sm:$0xff] %v2102_v15  }
 0x28a   : > { %2107 = vst [vmem:[%s4157_s14 + $0x300] sm:$0xff] %v2106_v18  }
 0x28b   : > { %2111 = vst [vmem:[%s4157_s14 + $0x308] sm:$0xff] %v2110_v19  }
 0x28c   : > { %2115 = vst [vmem:[%s4157_s14 + $0x310] sm:$0xff] %v2114_v21  }
 0x28d   : > { %2119 = vst [vmem:[%s4157_s14 + $0x318] sm:$0xff] %v2118_v22  }
 0x28e   : > { %2123 = vst [vmem:[%s4157_s14 + $0x320] sm:$0xff] %v2122_v24  }
 0x28f   : > { %2127 = vst [vmem:[%s4157_s14 + $0x328] sm:$0xff] %v2126_v25  }
 0x290   : > { %2131 = vst [vmem:[%s4157_s14 + $0x330] sm:$0xff] %v2130_v26  }
 0x291   : > { %2135 = vst [vmem:[%s4157_s14 + $0x338] sm:$0xff] %v2134_v27  }
 0x292 PF: > { %s20_s25 = sadd.s32 1, %s3065_s25   ;;  %s4269_s21 = sld [smem:[#allocation12_spill]] }
 0x293   : > { %p17_p1 = scmp.ge.s32.totalorder %s20_s25, 10   ;;  %s4270_s23 = sld [smem:[#allocation13_spill]] }
 0x294   : > { %s4271_s18 = smov %s3041_s19  ;;  %s4272_s19 = smov %s3045_s20 }
 0x295   : > { %s4273_s20 = smov %s3206_s17  ;;  %s4274_s22 = smov %s3061_s24 }
 0x296   : > { %s4275_s24 = smov %s4281_s26  ;;  %19 = sbr.rel (!%p17_p1) target bundleno = 11 (0xb), region = 236 }
 0x29b   :  { %2313 = vsyncpa [#allocation3], 1 }
 0x29c   :  { %2315 = vsyncpa [#allocation3 + $0x1], 1 }
 0x29d   :  { %2316 = vsyncpa [#allocation5], 1 }

</bundles_post_ra>
